<compile_context>
chip_gen: v7x
topology: tpu7x:2x2x1
jax: 0.10.0
libtpu: 0.0.40
codegen_flags: <defaults>
</compile_context>

<pallas_src>
import functools

import jax
import jax.numpy as jnp
from jax.experimental import pallas as pl
from jax.experimental.pallas import tpu as pltpu


def mhsa_kernel(x_ref, wqkv_ref, bqkv_ref, o_ref, *, num_heads: int, d_k: int):
    # x_ref: (Bb, N, D) block covering Bb batch elements.
    Bb, N, D = x_ref.shape
    x = x_ref[...].reshape(Bb * N, D)          # contiguous reshape, rows = Bb*N
    mxu_dtype = x.dtype

    # Fused QKV projection: ONE MXU pass (rows, D) @ (D, 3D), f32 accumulation.
    qkv = jnp.dot(x, wqkv_ref[...], preferred_element_type=jnp.float32)
    qkv = qkv + bqkv_ref[...].astype(jnp.float32)            # (rows, 3D) f32

    # Fold the softmax scale into q once: O(rows*D) instead of O(H*N^2).
    q = qkv[:, :D] * (1.0 / (d_k ** 0.5))
    k = qkv[:, D:2 * D]
    v = qkv[:, 2 * D:]

    # Feed the attention matmuls in the caller dtype (keeps bf16 MXU mode when
    # the caller passes bf16; a no-op for f32 inputs).
    q3 = q.astype(mxu_dtype).reshape(Bb, N, D)
    k3 = k.astype(mxu_dtype).reshape(Bb, N, D)
    v3 = v.astype(mxu_dtype).reshape(Bb, N, D)

    # Static unrolled loop over heads — appropriate at small H*N*d_k.
    # TODO(synk): for large shapes, bound live ranges (fori_loop + VMEM
    # scratch) and switch to the flash/KV-axis path described in the header.
    head_outs = []
    for h in range(num_heads):
        lo = h * d_k
        qh = q3[:, :, lo:lo + d_k]                 # (Bb, N, d_k)
        kh = k3[:, :, lo:lo + d_k]
        vh = v3[:, :, lo:lo + d_k]

        # scores[b, i, j] = sum_d qh[b, i, d] * kh[b, j, d] — contraction on
        # d_k, no explicit transpose of K.
        scores = jnp.einsum("bqd,bkd->bqk", qh, kh,
                            preferred_element_type=jnp.float32)   # (Bb,N,N) f32

        # Numerically-stable softmax kept in f32; normalize AFTER the PV
        # matmul so the divide touches (N, d_k) instead of (N, N).
        # TODO(synk): at large N, compute exp in bf16 on v6e/v7x (f32 on v5e).
        m = jnp.max(scores, axis=-1, keepdims=True)
        e = jnp.exp(scores - m)
        denom = jnp.sum(e, axis=-1, keepdims=True)

        pv = jnp.einsum("bqk,bkd->bqd", e.astype(mxu_dtype), vh,
                        preferred_element_type=jnp.float32)       # (Bb,N,d_k)
        head_outs.append(pv / denom)               # exact f32 normalization

    # One (Bb, N, D) store; head order matches the reference
    # transpose(1, 2).reshape(B, N, -1) layout.  (With D < 128 this is still a
    # masked store; batching rows per grid step amortizes it.)
    o_ref[...] = jnp.concatenate(head_outs, axis=-1).astype(o_ref.dtype)


def _pick_batch_block(B: int, N: int, target_rows: int = 256) -> int:
    """Largest divisor Bb of B with Bb*N <= target_rows, keeping >= 2 grid
    steps when B >= 2 so megacore can still shard the batch."""
    cap = max(1, target_rows // max(N, 1))
    best = 1
    for bb in range(1, B + 1):
        if B % bb:
            continue
        if bb > cap:
            break
        if B > 1 and B // bb < 2:
            break
        best = bb
    return best


def multi_head_self_attention(x, wq, wk, wv, bq, bk, bv, *, num_heads: int):
    B, N, D = x.shape
    assert D % num_heads == 0
    d_k = D // num_heads

    # Fuse the three projections into one (D, 3D) weight and one (1, 3D) bias.
    wqkv = jnp.concatenate([wq, wk, wv], axis=1)
    bqkv = jnp.concatenate([bq, bk, bv]).reshape(1, 3 * D)

    Bb = _pick_batch_block(B, N)
    grid = (B // Bb,)
    rows = Bb * N
    itm = x.dtype.itemsize

    # Per-step VMEM residency estimate.
    per_step = (
        4 * rows * D * itm                      # x + out blocks, double-buffered
        + 2 * (3 * D * D + 3 * D) * itm         # fused weight + bias (<= 2 bufs)
        + rows * 3 * D * 4                      # f32 qkv projection
        + 3 * rows * D * itm                    # q/k/v casts fed to the MXU
        + rows * D * 4                          # f32 per-head outputs (concat)
        + 6 * rows * N * 4                      # in-flight scores / exp temps
    )
    try:
        vmem_cap = pltpu.get_tpu_info().vmem_capacity_bytes
    except Exception:  # pragma: no cover - conservative fallback (v7x per-TC)
        vmem_cap = 64 * 2 ** 20
    ceiling = int(0.8 * vmem_cap)               # headroom for Mosaic scratch/sems
    if per_step > ceiling:
        raise ValueError(
            f"per-step VMEM estimate {per_step} B exceeds {ceiling} B; shrink "
            "the batch block / sequence tile or add the flash/KV-axis path")
    vmem_limit = min(ceiling, max(32 * 2 ** 20, int(per_step * 1.5)))

    kernel = functools.partial(mhsa_kernel, num_heads=num_heads, d_k=d_k)

    def run(single_buffer_invariants: bool):
        if single_buffer_invariants:
            # Invariant operands (constant index_map) never change across the
            # grid — single-buffer them to halve their VMEM footprint.
            w_spec = pl.BlockSpec((D, 3 * D), lambda b: (0, 0),
                                  pipeline_mode=pl.Buffered(1))
            b_spec = pl.BlockSpec((1, 3 * D), lambda b: (0, 0),
                                  pipeline_mode=pl.Buffered(1))
        else:
            w_spec = pl.BlockSpec((D, 3 * D), lambda b: (0, 0))
            b_spec = pl.BlockSpec((1, 3 * D), lambda b: (0, 0))

        return pl.pallas_call(
            kernel,
            out_shape=jax.ShapeDtypeStruct((B, N, D), x.dtype),
            grid_spec=pltpu.PrefetchScalarGridSpec(
                num_scalar_prefetch=0,
                grid=grid,
                in_specs=[
                    pl.BlockSpec((Bb, N, D), lambda b: (b, 0, 0)),  # x
                    w_spec,                                         # Wqkv
                    b_spec,                                         # bqkv
                ],
                out_specs=pl.BlockSpec((Bb, N, D), lambda b: (b, 0, 0)),
            ),
            compiler_params=pltpu.CompilerParams(
                dimension_semantics=("parallel",),
                vmem_limit_bytes=vmem_limit),
        )(x, wqkv, bqkv)

    try:
        return run(True)
    except Exception:
        # Fallback if this jax/Mosaic version rejects pl.Buffered(1) on the
        # top-level pipeline; default double-buffering is only a VMEM cost.
        return run(False)


def _reference(x, wq, wk, wv, bq, bk, bv, num_heads):
    # Plain-JAX reference mirroring the PyTorch forward.
    B, N, D = x.shape
    d_k = D // num_heads
    q = (x @ wq + bq).reshape(B, N, num_heads, d_k).transpose(0, 2, 1, 3)
    k = (x @ wk + bk).reshape(B, N, num_heads, d_k).transpose(0, 2, 1, 3)
    v = (x @ wv + bv).reshape(B, N, num_heads, d_k).transpose(0, 2, 1, 3)
    attn = jnp.einsum("bhqd,bhkd->bhqk", q, k) / (d_k ** 0.5)
    attn = jax.nn.softmax(attn, axis=-1)
    out = jnp.einsum("bhqk,bhkd->bhqd", attn, v)
    return out.transpose(0, 2, 1, 3).reshape(B, N, D)


if __name__ == "__main__":
    # Small shapes consistent with the module: batch=2, seq=8, dsize=32, heads=4.
    B, N, D, H = 2, 8, 32, 4

    key = jax.random.PRNGKey(0)
    kx, kq, kk, kv, kbq, kbk, kbv = jax.random.split(key, 7)

    x = jax.random.normal(kx, (B, N, D), dtype=jnp.float32)
    wq = jax.random.normal(kq, (D, D), dtype=jnp.float32) * (1.0 / D ** 0.5)
    wk = jax.random.normal(kk, (D, D), dtype=jnp.float32) * (1.0 / D ** 0.5)
    wv = jax.random.normal(kv, (D, D), dtype=jnp.float32) * (1.0 / D ** 0.5)
    bq = jax.random.normal(kbq, (D,), dtype=jnp.float32) * 0.01
    bk = jax.random.normal(kbk, (D,), dtype=jnp.float32) * 0.01
    bv = jax.random.normal(kbv, (D,), dtype=jnp.float32) * 0.01

    out = multi_head_self_attention(x, wq, wk, wv, bq, bk, bv, num_heads=H)
    out = jax.block_until_ready(out)

    ref = _reference(x, wq, wk, wv, bq, bk, bv, H)
    assert out.shape == (B, N, D)
    # Tolerance accommodates MXU f32 default-precision differences between the
    # Pallas matmuls and the XLA reference einsums (softmax math is exact f32).
    assert jnp.allclose(out, ref, atol=1e-2, rtol=1e-2), "mismatch vs reference"

    print("KERNEL_OK")
</pallas_src>

<mosaic_0001>
module attributes {stable_mosaic.version = 11 : i64} {
  func.func @mhsa_kernel(%arg0: i32, %arg1: memref<1x8x32xf32, #tpu.memory_space<vmem>>, %arg2: memref<32x96xf32, #tpu.memory_space<vmem>>, %arg3: memref<1x96xf32, #tpu.memory_space<vmem>>, %arg4: memref<1x8x32xf32, #tpu.memory_space<vmem>>) attributes {dimension_semantics = [#tpu.dimension_semantics<parallel>], iteration_bounds = array<i64: 2>, scalar_prefetch = 0 : i64, scratch_operands = 0 : i64, tpu.core_type = #tpu.core_type<tc>, window_params = [{transform_indices = @transform_0, window_bounds = array<i64: 1, 8, 32>}, {pipeline_mode = #tpu.pipeline_mode<synchronous>, transform_indices = @transform_1, window_bounds = array<i64: 32, 96>}, {pipeline_mode = #tpu.pipeline_mode<synchronous>, transform_indices = @transform_2, window_bounds = array<i64: 1, 96>}, {transform_indices = @transform_3, window_bounds = array<i64: 1, 8, 32>}]} {
    %c0 = arith.constant 0 : index
    %c0_0 = arith.constant 0 : index
    %c0_1 = arith.constant 0 : index
    %0 = vector.load %arg1[%c0, %c0_0, %c0_1] : memref<1x8x32xf32, #tpu.memory_space<vmem>>, vector<1x8x32xf32>
    %1 = vector.shape_cast %0 : vector<1x8x32xf32> to vector<8x32xf32>
    %c0_2 = arith.constant 0 : index
    %c0_3 = arith.constant 0 : index
    %2 = vector.load %arg2[%c0_2, %c0_3] : memref<32x96xf32, #tpu.memory_space<vmem>>, vector<32x96xf32>
    %cst = arith.constant dense<0.000000e+00> : vector<8x96xf32>
    %3 = tpu.matmul %1, %2, %cst {dimension_numbers = #tpu.dot_dimension_numbers<[1], [0], [0], [1], [0, 0, 1, 1], [], []>} : vector<8x32xf32>, vector<32x96xf32>, vector<8x96xf32> -> vector<8x96xf32>
    %c0_4 = arith.constant 0 : index
    %c0_5 = arith.constant 0 : index
    %4 = vector.load %arg3[%c0_4, %c0_5] : memref<1x96xf32, #tpu.memory_space<vmem>>, vector<1x96xf32>
    %5 = vector.broadcast %4 : vector<1x96xf32> to vector<8x96xf32>
    %6 = arith.addf %3, %5 : vector<8x96xf32>
    %7 = vector.extract_strided_slice %6 {offsets = [0, 0], sizes = [8, 32], strides = [1, 1]} : vector<8x96xf32> to vector<8x32xf32>
    %cst_6 = arith.constant 0.353553385 : f32
    %8 = vector.broadcast %cst_6 : f32 to vector<8x32xf32>
    %9 = arith.mulf %7, %8 : vector<8x32xf32>
    %10 = vector.extract_strided_slice %6 {offsets = [0, 32], sizes = [8, 32], strides = [1, 1]} : vector<8x96xf32> to vector<8x32xf32>
    %11 = vector.extract_strided_slice %6 {offsets = [0, 64], sizes = [8, 32], strides = [1, 1]} : vector<8x96xf32> to vector<8x32xf32>
    %12 = vector.shape_cast %9 : vector<8x32xf32> to vector<1x8x32xf32>
    %13 = vector.shape_cast %10 : vector<8x32xf32> to vector<1x8x32xf32>
    %14 = vector.shape_cast %11 : vector<8x32xf32> to vector<1x8x32xf32>
    %15 = vector.extract_strided_slice %12 {offsets = [0, 0, 0], sizes = [1, 8, 8], strides = [1, 1, 1]} : vector<1x8x32xf32> to vector<1x8x8xf32>
    %16 = vector.extract_strided_slice %13 {offsets = [0, 0, 0], sizes = [1, 8, 8], strides = [1, 1, 1]} : vector<1x8x32xf32> to vector<1x8x8xf32>
    %17 = vector.extract_strided_slice %14 {offsets = [0, 0, 0], sizes = [1, 8, 8], strides = [1, 1, 1]} : vector<1x8x32xf32> to vector<1x8x8xf32>
    "tpu.trace_start"() <{level = 10 : i32, message = "bqd,bkd->bqk"}> : () -> ()
    %cst_7 = arith.constant dense<0.000000e+00> : vector<1x8x8xf32>
    %18 = tpu.matmul %15, %16, %cst_7 {dimension_numbers = #tpu.dot_dimension_numbers<[2], [2], [1], [1], [0, 0, 0, 1, 1, 1], [0], [0]>} : vector<1x8x8xf32>, vector<1x8x8xf32>, vector<1x8x8xf32> -> vector<1x8x8xf32>
    "tpu.trace_stop"() : () -> ()
    %cst_8 = arith.constant dense<0xFF800000> : vector<1x8xf32>
    %19 = vector.multi_reduction <maximumf>, %18, %cst_8 [2] : vector<1x8x8xf32> to vector<1x8xf32>
    %20 = vector.shape_cast %19 : vector<1x8xf32> to vector<1x8x1xf32>
    %21 = vector.broadcast %20 : vector<1x8x1xf32> to vector<1x8x8xf32>
    %22 = arith.subf %18, %21 : vector<1x8x8xf32>
    %23 = math.exp %22 : vector<1x8x8xf32>
    %cst_9 = arith.constant dense<0.000000e+00> : vector<1x8xf32>
    %24 = vector.multi_reduction <add>, %23, %cst_9 [2] : vector<1x8x8xf32> to vector<1x8xf32>
    %25 = vector.shape_cast %24 : vector<1x8xf32> to vector<1x8x1xf32>
    "tpu.trace_start"() <{level = 10 : i32, message = "bqk,bkd->bqd"}> : () -> ()
    %cst_10 = arith.constant dense<0.000000e+00> : vector<1x8x8xf32>
    %26 = tpu.matmul %23, %17, %cst_10 {dimension_numbers = #tpu.dot_dimension_numbers<[2], [1], [1], [2], [0, 0, 0, 1, 1, 2], [0], [0]>} : vector<1x8x8xf32>, vector<1x8x8xf32>, vector<1x8x8xf32> -> vector<1x8x8xf32>
    "tpu.trace_stop"() : () -> ()
    %27 = vector.broadcast %25 : vector<1x8x1xf32> to vector<1x8x8xf32>
    %28 = arith.divf %26, %27 : vector<1x8x8xf32>
    %29 = vector.extract_strided_slice %12 {offsets = [0, 0, 8], sizes = [1, 8, 8], strides = [1, 1, 1]} : vector<1x8x32xf32> to vector<1x8x8xf32>
    %30 = vector.extract_strided_slice %13 {offsets = [0, 0, 8], sizes = [1, 8, 8], strides = [1, 1, 1]} : vector<1x8x32xf32> to vector<1x8x8xf32>
    %31 = vector.extract_strided_slice %14 {offsets = [0, 0, 8], sizes = [1, 8, 8], strides = [1, 1, 1]} : vector<1x8x32xf32> to vector<1x8x8xf32>
    "tpu.trace_start"() <{level = 10 : i32, message = "bqd,bkd->bqk"}> : () -> ()
    %cst_11 = arith.constant dense<0.000000e+00> : vector<1x8x8xf32>
    %32 = tpu.matmul %29, %30, %cst_11 {dimension_numbers = #tpu.dot_dimension_numbers<[2], [2], [1], [1], [0, 0, 0, 1, 1, 1], [0], [0]>} : vector<1x8x8xf32>, vector<1x8x8xf32>, vector<1x8x8xf32> -> vector<1x8x8xf32>
    "tpu.trace_stop"() : () -> ()
    %cst_12 = arith.constant dense<0xFF800000> : vector<1x8xf32>
    %33 = vector.multi_reduction <maximumf>, %32, %cst_12 [2] : vector<1x8x8xf32> to vector<1x8xf32>
    %34 = vector.shape_cast %33 : vector<1x8xf32> to vector<1x8x1xf32>
    %35 = vector.broadcast %34 : vector<1x8x1xf32> to vector<1x8x8xf32>
    %36 = arith.subf %32, %35 : vector<1x8x8xf32>
    %37 = math.exp %36 : vector<1x8x8xf32>
    %cst_13 = arith.constant dense<0.000000e+00> : vector<1x8xf32>
    %38 = vector.multi_reduction <add>, %37, %cst_13 [2] : vector<1x8x8xf32> to vector<1x8xf32>
    %39 = vector.shape_cast %38 : vector<1x8xf32> to vector<1x8x1xf32>
    "tpu.trace_start"() <{level = 10 : i32, message = "bqk,bkd->bqd"}> : () -> ()
    %cst_14 = arith.constant dense<0.000000e+00> : vector<1x8x8xf32>
    %40 = tpu.matmul %37, %31, %cst_14 {dimension_numbers = #tpu.dot_dimension_numbers<[2], [1], [1], [2], [0, 0, 0, 1, 1, 2], [0], [0]>} : vector<1x8x8xf32>, vector<1x8x8xf32>, vector<1x8x8xf32> -> vector<1x8x8xf32>
    "tpu.trace_stop"() : () -> ()
    %41 = vector.broadcast %39 : vector<1x8x1xf32> to vector<1x8x8xf32>
    %42 = arith.divf %40, %41 : vector<1x8x8xf32>
    %43 = vector.extract_strided_slice %12 {offsets = [0, 0, 16], sizes = [1, 8, 8], strides = [1, 1, 1]} : vector<1x8x32xf32> to vector<1x8x8xf32>
    %44 = vector.extract_strided_slice %13 {offsets = [0, 0, 16], sizes = [1, 8, 8], strides = [1, 1, 1]} : vector<1x8x32xf32> to vector<1x8x8xf32>
    %45 = vector.extract_strided_slice %14 {offsets = [0, 0, 16], sizes = [1, 8, 8], strides = [1, 1, 1]} : vector<1x8x32xf32> to vector<1x8x8xf32>
    "tpu.trace_start"() <{level = 10 : i32, message = "bqd,bkd->bqk"}> : () -> ()
    %cst_15 = arith.constant dense<0.000000e+00> : vector<1x8x8xf32>
    %46 = tpu.matmul %43, %44, %cst_15 {dimension_numbers = #tpu.dot_dimension_numbers<[2], [2], [1], [1], [0, 0, 0, 1, 1, 1], [0], [0]>} : vector<1x8x8xf32>, vector<1x8x8xf32>, vector<1x8x8xf32> -> vector<1x8x8xf32>
    "tpu.trace_stop"() : () -> ()
    %cst_16 = arith.constant dense<0xFF800000> : vector<1x8xf32>
    %47 = vector.multi_reduction <maximumf>, %46, %cst_16 [2] : vector<1x8x8xf32> to vector<1x8xf32>
    %48 = vector.shape_cast %47 : vector<1x8xf32> to vector<1x8x1xf32>
    %49 = vector.broadcast %48 : vector<1x8x1xf32> to vector<1x8x8xf32>
    %50 = arith.subf %46, %49 : vector<1x8x8xf32>
    %51 = math.exp %50 : vector<1x8x8xf32>
    %cst_17 = arith.constant dense<0.000000e+00> : vector<1x8xf32>
    %52 = vector.multi_reduction <add>, %51, %cst_17 [2] : vector<1x8x8xf32> to vector<1x8xf32>
    %53 = vector.shape_cast %52 : vector<1x8xf32> to vector<1x8x1xf32>
    "tpu.trace_start"() <{level = 10 : i32, message = "bqk,bkd->bqd"}> : () -> ()
    %cst_18 = arith.constant dense<0.000000e+00> : vector<1x8x8xf32>
    %54 = tpu.matmul %51, %45, %cst_18 {dimension_numbers = #tpu.dot_dimension_numbers<[2], [1], [1], [2], [0, 0, 0, 1, 1, 2], [0], [0]>} : vector<1x8x8xf32>, vector<1x8x8xf32>, vector<1x8x8xf32> -> vector<1x8x8xf32>
    "tpu.trace_stop"() : () -> ()
    %55 = vector.broadcast %53 : vector<1x8x1xf32> to vector<1x8x8xf32>
    %56 = arith.divf %54, %55 : vector<1x8x8xf32>
    %57 = vector.extract_strided_slice %12 {offsets = [0, 0, 24], sizes = [1, 8, 8], strides = [1, 1, 1]} : vector<1x8x32xf32> to vector<1x8x8xf32>
    %58 = vector.extract_strided_slice %13 {offsets = [0, 0, 24], sizes = [1, 8, 8], strides = [1, 1, 1]} : vector<1x8x32xf32> to vector<1x8x8xf32>
    %59 = vector.extract_strided_slice %14 {offsets = [0, 0, 24], sizes = [1, 8, 8], strides = [1, 1, 1]} : vector<1x8x32xf32> to vector<1x8x8xf32>
    "tpu.trace_start"() <{level = 10 : i32, message = "bqd,bkd->bqk"}> : () -> ()
    %cst_19 = arith.constant dense<0.000000e+00> : vector<1x8x8xf32>
    %60 = tpu.matmul %57, %58, %cst_19 {dimension_numbers = #tpu.dot_dimension_numbers<[2], [2], [1], [1], [0, 0, 0, 1, 1, 1], [0], [0]>} : vector<1x8x8xf32>, vector<1x8x8xf32>, vector<1x8x8xf32> -> vector<1x8x8xf32>
    "tpu.trace_stop"() : () -> ()
    %cst_20 = arith.constant dense<0xFF800000> : vector<1x8xf32>
    %61 = vector.multi_reduction <maximumf>, %60, %cst_20 [2] : vector<1x8x8xf32> to vector<1x8xf32>
    %62 = vector.shape_cast %61 : vector<1x8xf32> to vector<1x8x1xf32>
    %63 = vector.broadcast %62 : vector<1x8x1xf32> to vector<1x8x8xf32>
    %64 = arith.subf %60, %63 : vector<1x8x8xf32>
    %65 = math.exp %64 : vector<1x8x8xf32>
    %cst_21 = arith.constant dense<0.000000e+00> : vector<1x8xf32>
    %66 = vector.multi_reduction <add>, %65, %cst_21 [2] : vector<1x8x8xf32> to vector<1x8xf32>
    %67 = vector.shape_cast %66 : vector<1x8xf32> to vector<1x8x1xf32>
    "tpu.trace_start"() <{level = 10 : i32, message = "bqk,bkd->bqd"}> : () -> ()
    %cst_22 = arith.constant dense<0.000000e+00> : vector<1x8x8xf32>
    %68 = tpu.matmul %65, %59, %cst_22 {dimension_numbers = #tpu.dot_dimension_numbers<[2], [1], [1], [2], [0, 0, 0, 1, 1, 2], [0], [0]>} : vector<1x8x8xf32>, vector<1x8x8xf32>, vector<1x8x8xf32> -> vector<1x8x8xf32>
    "tpu.trace_stop"() : () -> ()
    %69 = vector.broadcast %67 : vector<1x8x1xf32> to vector<1x8x8xf32>
    %70 = arith.divf %68, %69 : vector<1x8x8xf32>
    %71 = tpu.concatenate %28, %42, %56, %70 in 2 : vector<1x8x8xf32>, vector<1x8x8xf32>, vector<1x8x8xf32>, vector<1x8x8xf32> -> vector<1x8x32xf32>
    %c0_23 = arith.constant 0 : index
    %c0_24 = arith.constant 0 : index
    %c0_25 = arith.constant 0 : index
    %72 = vector.load %arg4[%c0_23, %c0_24, %c0_25] : memref<1x8x32xf32, #tpu.memory_space<vmem>>, vector<1x8x32xf32>
    tpu.vector_store %arg4[%c0_23, %c0_24, %c0_25], %71 {strides = array<i32>} : memref<1x8x32xf32, #tpu.memory_space<vmem>>, vector<1x8x32xf32>,
    return
  }
  func.func @transform_0(%arg0: i32) -> (i32, i32, i32) {
    %c0_i32 = arith.constant 0 : i32
    %c0_i32_0 = arith.constant 0 : i32
    %c0_i32_1 = arith.constant 0 : i32
    return %arg0, %c0_i32, %c0_i32_0 : i32, i32, i32
  }
  func.func @transform_1(%arg0: i32) -> (i32, i32) {
    %c0_i32 = arith.constant 0 : i32
    %c0_i32_0 = arith.constant 0 : i32
    %c0_i32_1 = arith.constant 0 : i32
    return %c0_i32, %c0_i32_0 : i32, i32
  }
  func.func @transform_2(%arg0: i32) -> (i32, i32) {
    %c0_i32 = arith.constant 0 : i32
    %c0_i32_0 = arith.constant 0 : i32
    %c0_i32_1 = arith.constant 0 : i32
    return %c0_i32, %c0_i32_0 : i32, i32
  }
  func.func @transform_3(%arg0: i32) -> (i32, i32, i32) {
    %c0_i32 = arith.constant 0 : i32
    %c0_i32_0 = arith.constant 0 : i32
    %c0_i32_1 = arith.constant 0 : i32
    return %arg0, %c0_i32, %c0_i32_0 : i32, i32, i32
  }
}

module attributes {stable_mosaic.version = 11 : i64} {
  func.func @mhsa_kernel(%arg0: i32, %arg1: memref<1x8x32xf32, #tpu.memory_space<vmem>>, %arg2: memref<32x96xf32, #tpu.memory_space<vmem>>, %arg3: memref<1x96xf32, #tpu.memory_space<vmem>>, %arg4: memref<1x8x32xf32, #tpu.memory_space<vmem>>) attributes {dimension_semantics = [#tpu.dimension_semantics<parallel>], iteration_bounds = array<i64: 2>, scalar_prefetch = 0 : i64, scratch_operands = 0 : i64, tpu.core_type = #tpu.core_type<tc>, window_params = [{transform_indices = @transform_0, window_bounds = array<i64: 1, 8, 32>}, {pipeline_mode = #tpu.pipeline_mode<synchronous>, transform_indices = @transform_1, window_bounds = array<i64: 32, 96>}, {pipeline_mode = #tpu.pipeline_mode<synchronous>, transform_indices = @transform_2, window_bounds = array<i64: 1, 96>}, {transform_indices = @transform_3, window_bounds = array<i64: 1, 8, 32>}]} {
    %c0 = arith.constant 0 : index
    %c0_0 = arith.constant 0 : index
    %c0_1 = arith.constant 0 : index
    %0 = vector.load %arg1[%c0, %c0_0, %c0_1] : memref<1x8x32xf32, #tpu.memory_space<vmem>>, vector<1x8x32xf32>
    %1 = vector.shape_cast %0 : vector<1x8x32xf32> to vector<8x32xf32>
    %c0_2 = arith.constant 0 : index
    %c0_3 = arith.constant 0 : index
    %2 = vector.load %arg2[%c0_2, %c0_3] : memref<32x96xf32, #tpu.memory_space<vmem>>, vector<32x96xf32>
    %cst = arith.constant dense<0.000000e+00> : vector<8x96xf32>
    %3 = tpu.matmul %1, %2, %cst {dimension_numbers = #tpu.dot_dimension_numbers<[1], [0], [0], [1], [0, 0, 1, 1], [], []>} : vector<8x32xf32>, vector<32x96xf32>, vector<8x96xf32> -> vector<8x96xf32>
    %c0_4 = arith.constant 0 : index
    %c0_5 = arith.constant 0 : index
    %4 = vector.load %arg3[%c0_4, %c0_5] : memref<1x96xf32, #tpu.memory_space<vmem>>, vector<1x96xf32>
    %5 = vector.broadcast %4 : vector<1x96xf32> to vector<8x96xf32>
    %6 = arith.addf %3, %5 : vector<8x96xf32>
    %7 = vector.extract_strided_slice %6 {offsets = [0, 0], sizes = [8, 32], strides = [1, 1]} : vector<8x96xf32> to vector<8x32xf32>
    %cst_6 = arith.constant 0.353553385 : f32
    %8 = vector.broadcast %cst_6 : f32 to vector<8x32xf32>
    %9 = arith.mulf %7, %8 : vector<8x32xf32>
    %10 = vector.extract_strided_slice %6 {offsets = [0, 32], sizes = [8, 32], strides = [1, 1]} : vector<8x96xf32> to vector<8x32xf32>
    %11 = vector.extract_strided_slice %6 {offsets = [0, 64], sizes = [8, 32], strides = [1, 1]} : vector<8x96xf32> to vector<8x32xf32>
    %12 = vector.shape_cast %9 : vector<8x32xf32> to vector<1x8x32xf32>
    %13 = vector.shape_cast %10 : vector<8x32xf32> to vector<1x8x32xf32>
    %14 = vector.shape_cast %11 : vector<8x32xf32> to vector<1x8x32xf32>
    %15 = vector.extract_strided_slice %12 {offsets = [0, 0, 0], sizes = [1, 8, 8], strides = [1, 1, 1]} : vector<1x8x32xf32> to vector<1x8x8xf32>
    %16 = vector.extract_strided_slice %13 {offsets = [0, 0, 0], sizes = [1, 8, 8], strides = [1, 1, 1]} : vector<1x8x32xf32> to vector<1x8x8xf32>
    %17 = vector.extract_strided_slice %14 {offsets = [0, 0, 0], sizes = [1, 8, 8], strides = [1, 1, 1]} : vector<1x8x32xf32> to vector<1x8x8xf32>
    "tpu.trace_start"() <{level = 10 : i32, message = "bqd,bkd->bqk"}> : () -> ()
    %cst_7 = arith.constant dense<0.000000e+00> : vector<1x8x8xf32>
    %18 = tpu.matmul %15, %16, %cst_7 {dimension_numbers = #tpu.dot_dimension_numbers<[2], [2], [1], [1], [0, 0, 0, 1, 1, 1], [0], [0]>} : vector<1x8x8xf32>, vector<1x8x8xf32>, vector<1x8x8xf32> -> vector<1x8x8xf32>
    "tpu.trace_stop"() : () -> ()
    %cst_8 = arith.constant dense<0xFF800000> : vector<1x8xf32>
    %19 = vector.multi_reduction <maximumf>, %18, %cst_8 [2] : vector<1x8x8xf32> to vector<1x8xf32>
    %20 = vector.shape_cast %19 : vector<1x8xf32> to vector<1x8x1xf32>
    %21 = vector.broadcast %20 : vector<1x8x1xf32> to vector<1x8x8xf32>
    %22 = arith.subf %18, %21 : vector<1x8x8xf32>
    %23 = math.exp %22 : vector<1x8x8xf32>
    %cst_9 = arith.constant dense<0.000000e+00> : vector<1x8xf32>
    %24 = vector.multi_reduction <add>, %23, %cst_9 [2] : vector<1x8x8xf32> to vector<1x8xf32>
    %25 = vector.shape_cast %24 : vector<1x8xf32> to vector<1x8x1xf32>
    "tpu.trace_start"() <{level = 10 : i32, message = "bqk,bkd->bqd"}> : () -> ()
    %cst_10 = arith.constant dense<0.000000e+00> : vector<1x8x8xf32>
    %26 = tpu.matmul %23, %17, %cst_10 {dimension_numbers = #tpu.dot_dimension_numbers<[2], [1], [1], [2], [0, 0, 0, 1, 1, 2], [0], [0]>} : vector<1x8x8xf32>, vector<1x8x8xf32>, vector<1x8x8xf32> -> vector<1x8x8xf32>
    "tpu.trace_stop"() : () -> ()
    %27 = vector.broadcast %25 : vector<1x8x1xf32> to vector<1x8x8xf32>
    %28 = arith.divf %26, %27 : vector<1x8x8xf32>
    %29 = vector.extract_strided_slice %12 {offsets = [0, 0, 8], sizes = [1, 8, 8], strides = [1, 1, 1]} : vector<1x8x32xf32> to vector<1x8x8xf32>
    %30 = vector.extract_strided_slice %13 {offsets = [0, 0, 8], sizes = [1, 8, 8], strides = [1, 1, 1]} : vector<1x8x32xf32> to vector<1x8x8xf32>
    %31 = vector.extract_strided_slice %14 {offsets = [0, 0, 8], sizes = [1, 8, 8], strides = [1, 1, 1]} : vector<1x8x32xf32> to vector<1x8x8xf32>
    "tpu.trace_start"() <{level = 10 : i32, message = "bqd,bkd->bqk"}> : () -> ()
    %cst_11 = arith.constant dense<0.000000e+00> : vector<1x8x8xf32>
    %32 = tpu.matmul %29, %30, %cst_11 {dimension_numbers = #tpu.dot_dimension_numbers<[2], [2], [1], [1], [0, 0, 0, 1, 1, 1], [0], [0]>} : vector<1x8x8xf32>, vector<1x8x8xf32>, vector<1x8x8xf32> -> vector<1x8x8xf32>
    "tpu.trace_stop"() : () -> ()
    %cst_12 = arith.constant dense<0xFF800000> : vector<1x8xf32>
    %33 = vector.multi_reduction <maximumf>, %32, %cst_12 [2] : vector<1x8x8xf32> to vector<1x8xf32>
    %34 = vector.shape_cast %33 : vector<1x8xf32> to vector<1x8x1xf32>
    %35 = vector.broadcast %34 : vector<1x8x1xf32> to vector<1x8x8xf32>
    %36 = arith.subf %32, %35 : vector<1x8x8xf32>
    %37 = math.exp %36 : vector<1x8x8xf32>
    %cst_13 = arith.constant dense<0.000000e+00> : vector<1x8xf32>
    %38 = vector.multi_reduction <add>, %37, %cst_13 [2] : vector<1x8x8xf32> to vector<1x8xf32>
    %39 = vector.shape_cast %38 : vector<1x8xf32> to vector<1x8x1xf32>
    "tpu.trace_start"() <{level = 10 : i32, message = "bqk,bkd->bqd"}> : () -> ()
    %cst_14 = arith.constant dense<0.000000e+00> : vector<1x8x8xf32>
    %40 = tpu.matmul %37, %31, %cst_14 {dimension_numbers = #tpu.dot_dimension_numbers<[2], [1], [1], [2], [0, 0, 0, 1, 1, 2], [0], [0]>} : vector<1x8x8xf32>, vector<1x8x8xf32>, vector<1x8x8xf32> -> vector<1x8x8xf32>
    "tpu.trace_stop"() : () -> ()
    %41 = vector.broadcast %39 : vector<1x8x1xf32> to vector<1x8x8xf32>
    %42 = arith.divf %40, %41 : vector<1x8x8xf32>
    %43 = vector.extract_strided_slice %12 {offsets = [0, 0, 16], sizes = [1, 8, 8], strides = [1, 1, 1]} : vector<1x8x32xf32> to vector<1x8x8xf32>
    %44 = vector.extract_strided_slice %13 {offsets = [0, 0, 16], sizes = [1, 8, 8], strides = [1, 1, 1]} : vector<1x8x32xf32> to vector<1x8x8xf32>
    %45 = vector.extract_strided_slice %14 {offsets = [0, 0, 16], sizes = [1, 8, 8], strides = [1, 1, 1]} : vector<1x8x32xf32> to vector<1x8x8xf32>
    "tpu.trace_start"() <{level = 10 : i32, message = "bqd,bkd->bqk"}> : () -> ()
    %cst_15 = arith.constant dense<0.000000e+00> : vector<1x8x8xf32>
    %46 = tpu.matmul %43, %44, %cst_15 {dimension_numbers = #tpu.dot_dimension_numbers<[2], [2], [1], [1], [0, 0, 0, 1, 1, 1], [0], [0]>} : vector<1x8x8xf32>, vector<1x8x8xf32>, vector<1x8x8xf32> -> vector<1x8x8xf32>
    "tpu.trace_stop"() : () -> ()
    %cst_16 = arith.constant dense<0xFF800000> : vector<1x8xf32>
    %47 = vector.multi_reduction <maximumf>, %46, %cst_16 [2] : vector<1x8x8xf32> to vector<1x8xf32>
    %48 = vector.shape_cast %47 : vector<1x8xf32> to vector<1x8x1xf32>
    %49 = vector.broadcast %48 : vector<1x8x1xf32> to vector<1x8x8xf32>
    %50 = arith.subf %46, %49 : vector<1x8x8xf32>
    %51 = math.exp %50 : vector<1x8x8xf32>
    %cst_17 = arith.constant dense<0.000000e+00> : vector<1x8xf32>
    %52 = vector.multi_reduction <add>, %51, %cst_17 [2] : vector<1x8x8xf32> to vector<1x8xf32>
    %53 = vector.shape_cast %52 : vector<1x8xf32> to vector<1x8x1xf32>
    "tpu.trace_start"() <{level = 10 : i32, message = "bqk,bkd->bqd"}> : () -> ()
    %cst_18 = arith.constant dense<0.000000e+00> : vector<1x8x8xf32>
    %54 = tpu.matmul %51, %45, %cst_18 {dimension_numbers = #tpu.dot_dimension_numbers<[2], [1], [1], [2], [0, 0, 0, 1, 1, 2], [0], [0]>} : vector<1x8x8xf32>, vector<1x8x8xf32>, vector<1x8x8xf32> -> vector<1x8x8xf32>
    "tpu.trace_stop"() : () -> ()
    %55 = vector.broadcast %53 : vector<1x8x1xf32> to vector<1x8x8xf32>
    %56 = arith.divf %54, %55 : vector<1x8x8xf32>
    %57 = vector.extract_strided_slice %12 {offsets = [0, 0, 24], sizes = [1, 8, 8], strides = [1, 1, 1]} : vector<1x8x32xf32> to vector<1x8x8xf32>
    %58 = vector.extract_strided_slice %13 {offsets = [0, 0, 24], sizes = [1, 8, 8], strides = [1, 1, 1]} : vector<1x8x32xf32> to vector<1x8x8xf32>
    %59 = vector.extract_strided_slice %14 {offsets = [0, 0, 24], sizes = [1, 8, 8], strides = [1, 1, 1]} : vector<1x8x32xf32> to vector<1x8x8xf32>
    "tpu.trace_start"() <{level = 10 : i32, message = "bqd,bkd->bqk"}> : () -> ()
    %cst_19 = arith.constant dense<0.000000e+00> : vector<1x8x8xf32>
    %60 = tpu.matmul %57, %58, %cst_19 {dimension_numbers = #tpu.dot_dimension_numbers<[2], [2], [1], [1], [0, 0, 0, 1, 1, 1], [0], [0]>} : vector<1x8x8xf32>, vector<1x8x8xf32>, vector<1x8x8xf32> -> vector<1x8x8xf32>
    "tpu.trace_stop"() : () -> ()
    %cst_20 = arith.constant dense<0xFF800000> : vector<1x8xf32>
    %61 = vector.multi_reduction <maximumf>, %60, %cst_20 [2] : vector<1x8x8xf32> to vector<1x8xf32>
    %62 = vector.shape_cast %61 : vector<1x8xf32> to vector<1x8x1xf32>
    %63 = vector.broadcast %62 : vector<1x8x1xf32> to vector<1x8x8xf32>
    %64 = arith.subf %60, %63 : vector<1x8x8xf32>
    %65 = math.exp %64 : vector<1x8x8xf32>
    %cst_21 = arith.constant dense<0.000000e+00> : vector<1x8xf32>
    %66 = vector.multi_reduction <add>, %65, %cst_21 [2] : vector<1x8x8xf32> to vector<1x8xf32>
    %67 = vector.shape_cast %66 : vector<1x8xf32> to vector<1x8x1xf32>
    "tpu.trace_start"() <{level = 10 : i32, message = "bqk,bkd->bqd"}> : () -> ()
    %cst_22 = arith.constant dense<0.000000e+00> : vector<1x8x8xf32>
    %68 = tpu.matmul %65, %59, %cst_22 {dimension_numbers = #tpu.dot_dimension_numbers<[2], [1], [1], [2], [0, 0, 0, 1, 1, 2], [0], [0]>} : vector<1x8x8xf32>, vector<1x8x8xf32>, vector<1x8x8xf32> -> vector<1x8x8xf32>
    "tpu.trace_stop"() : () -> ()
    %69 = vector.broadcast %67 : vector<1x8x1xf32> to vector<1x8x8xf32>
    %70 = arith.divf %68, %69 : vector<1x8x8xf32>
    %71 = tpu.concatenate %28, %42, %56, %70 in 2 : vector<1x8x8xf32>, vector<1x8x8xf32>, vector<1x8x8xf32>, vector<1x8x8xf32> -> vector<1x8x32xf32>
    %c0_23 = arith.constant 0 : index
    %c0_24 = arith.constant 0 : index
    %c0_25 = arith.constant 0 : index
    %72 = vector.load %arg4[%c0_23, %c0_24, %c0_25] : memref<1x8x32xf32, #tpu.memory_space<vmem>>, vector<1x8x32xf32>
    tpu.vector_store %arg4[%c0_23, %c0_24, %c0_25], %71 {strides = array<i32>} : memref<1x8x32xf32, #tpu.memory_space<vmem>>, vector<1x8x32xf32>,
    return
  }
  func.func @transform_0(%arg0: i32) -> (i32, i32, i32) {
    %c0_i32 = arith.constant 0 : i32
    %c0_i32_0 = arith.constant 0 : i32
    %c0_i32_1 = arith.constant 0 : i32
    return %arg0, %c0_i32, %c0_i32_0 : i32, i32, i32
  }
  func.func @transform_1(%arg0: i32) -> (i32, i32) {
    %c0_i32 = arith.constant 0 : i32
    %c0_i32_0 = arith.constant 0 : i32
    %c0_i32_1 = arith.constant 0 : i32
    return %c0_i32, %c0_i32_0 : i32, i32
  }
  func.func @transform_2(%arg0: i32) -> (i32, i32) {
    %c0_i32 = arith.constant 0 : i32
    %c0_i32_0 = arith.constant 0 : i32
    %c0_i32_1 = arith.constant 0 : i32
    return %c0_i32, %c0_i32_0 : i32, i32
  }
  func.func @transform_3(%arg0: i32) -> (i32, i32, i32) {
    %c0_i32 = arith.constant 0 : i32
    %c0_i32_0 = arith.constant 0 : i32
    %c0_i32_1 = arith.constant 0 : i32
    return %arg0, %c0_i32, %c0_i32_0 : i32, i32, i32
  }
}

</mosaic_0001>

<bundles_post_ra>
// kernel: tpu_custom_call.1
= control target key start
LH: loop header
LB: loop body
LE: loop exit
PB: predicated region body
PF: predicated region fallthrough
CT: control target
= control target key end

     0   :  { %8 = vsyncpa [#allocation3], 0  ;;  %s1683_s0 = inlined_call_operand.hbm [shape: f32[2,8,32], index: 0, kind: input, shape index: {}]   ;;  %s1684_s1 = inlined_call_operand.hbm [shape: f32[32,96], index: 1, kind: input, shape index: {}]   ;;  %s1685_s2 = inlined_call_operand.vmem [shape: f32[1,96], index: 2, kind: input, shape index: {}]   ;;  %s1686_s3 = inlined_call_operand.hbm [shape: f32[2,8,32], index: 3, kind: output, shape index: {}]  }
   0x1   :  { %10 = vsyncpa [#allocation3 + $0x1], 0 }
   0x2   :  { %11 = vsyncpa [#allocation6], 0 }
   0x3   :  { %12 = vsyncpa [#allocation4], 0 }
   0x4   :  { %14 = vsyncpa [#allocation4 + $0x1], 0  ;;  %s1431_s12 = smov 0   ;;  %s1433_s13 = smov 0  }
   0x5   :  { %s1435_s14 = smov 0   ;;  %s1437_s15 = smov 0  }
   0x6 LB: > { %s1452_s16 = sadd.s32 4294967295, %s1387_s15   ;;  %s1061_s17 = sadd.s32 4294967294, %s1387_s15   ;;  %s1387_s15 = sphi %s1437_s15, %s1706_s15   ;;  %s1383_s14 = sphi %s1435_s14, %s1705_s14   ;;  %s1379_s13 = sphi %s1433_s13, %s1704_s13   ;;  %s1375_s12 = sphi %s1431_s12, %s1703_s12  }
   0x7   : > { %p40_p0 = scmp.ne.s32.totalorder %s1379_s13, %s1375_s12  ;;  %p1687_p1 = scmp.eq.s32.totalorder %s1452_s16, 0 }
   0x8   : > { %p112_p3 = scmp.eq.s32.totalorder %s1061_s17, 1  ;;  %p1062_p5 = scmp.ge.s32.totalorder %s1387_s15, 1 }
   0x9   : > { %p1461_p4 = por %p1687_p1, %p40_p0  ;;  %p119_p7 = scmp.lt.s32.totalorder %s1387_s15, 3 }
   0xa   : > { %p1466_p6 = por %p112_p3, %p40_p0  ;;  %s1389_s21 = smov [#allocation5]  }
   0xb   : > { %s1690_s18 = scalar_select %p1461_p4, 1, 0 }
   0xc   : > { %s1691_s19 = scalar_select %p1466_p6, 1, 0 }
   0xd   : > { %p1471_p8 = pnand %p1062_p5, %p119_p7  ;;  %s131_s22 = sshll.u32 %s1389_s21, 4  ;;  %s1475_s22 = int_to_ptr.vmem [resolvable:$true] %s131_s22 }
   0xe   : > { %s1487_s24 = sadd.s32 1, %s1387_s15   ;;  %s27_s25 = sadd.s32 1, %s1383_s14 }
   0xf   : > { %s1692_s20 = scalar_select %p1471_p8, 1, 0 }
  0x10   : > { %p1175_p9 = pneg %p1471_p8  ;;  %s24_s26 = ssub.s32 %s1387_s15, %s1487_s24 }
  0x11   : > { %s1259_s29 = scalar_lea.hbm %s1684_s1, 512 }
  0x12   : > { %p1482_p11 = pnand %p1175_p9, %p1687_p1  ;;  %p1260_p12 = scmp.ne.s32.totalorder %s1684_s1, %s1259_s29 }
  0x13   : > { %p1266_p5 = scmp.lt.u32.totalorder %s1259_s29, %s1684_s1 }
  0x14   : > { %p1261_p13 = pneg %p1482_p11 }
  0x16   : > { %p1262_p0 = pnand %p1261_p13, %p1260_p12 }
  0x18   : > { %p1263_p3 = pneg %p1262_p0 }
  0x1a   : > { %p1268_p7 = pnand %p1266_p5, %p1263_p3 }
  0x1c   : > { %1271 = shalt.err (!%p1268_p7)
}
  0x1d   : > { %s1272_s7 = scalar_lea.vmem %s1475_s22, 512  ;;  %p1280_p2 = scmp.lt.s32.totalorder %s1475_s22, %s1475_s22 }
  0x1e   : > { %p1273_p9 = scmp.ne.s32.totalorder %s1475_s22, %s1272_s7  ;;  %p1281_p6 = scmp.lt.s32.totalorder %s1272_s7, %s1272_s7 }
  0x20   : > { %p1275_p10 = pnand %p1273_p9, %p1261_p13  ;;  %p1282_p4 = por %p1281_p6, %p1280_p2 }
  0x22   : > { %p1276_p1 = pneg %p1275_p10 }
  0x24   : > { %p1283_p8 = pnand %p1282_p4, %p1276_p1 }
  0x26   : > { %1286 = shalt.err (!%p1283_p8)
}
  0x27   : > { %s1390_s8 = smov 128   ;;  %s1391_s9 = smov 8  }
  0x28   : > { %1178 = dma.hbm_to_vmem [thread:$0]  (!%p1482_p11), %s1684_s1, 512, %s1475_s22, [#allocation6], %s1390_s8, %s1390_s8, %s1391_s9  }
  0x29   : > { %p25_p2 = scmp.eq.s32.totalorder %s24_s26, 0  ;;  %p34_p1 = scmp.ne.s32.totalorder %s1383_s14, %s1379_s13 }
  0x2a   : > { %p35_p4 = scmp.eq.s32.totalorder %s1387_s15, 0  ;;  %p1188_p6 = scmp.lt.s32.totalorder %s1387_s15, 2 }
  0x2b   : > { %s1518_s17 = scalar_select %p25_p2, %s1383_s14, %s27_s25  }
  0x2c   : > { %p36_p8 = por %p35_p4, %p34_p1  ;;  %p1694_p10 = scmp.eq.s32.totalorder %s1452_s16, 1 }
  0x2d   : > { %s148_s27 = sand.u32 1, %s1383_s14   ;;  %s1066_s28 = sshll.u32 %s1387_s15, 7 }
  0x2e   : > { %p1522_p12 = por %p1694_p10, %p34_p1  ;;  %s1065_s29 = sshll.u32 %s148_s27, 3 }
  0x2f   : > { %s1531_s4 = scalar_lea.hbm %s1683_s0, %s1066_s28  ;;  %s152_s22 = scalar_lea.vmem [#allocation2], %s1065_s29 }
  0x30   : > { %s159_s25 = sshll.u32 %s152_s22, 4  ;;  %p1533_p11 = pnand %p1188_p6, %p36_p8  ;;  %s1537_s25 = int_to_ptr.vmem [resolvable:$true] %s159_s25 }
  0x31   : > { %s149_s5 = scalar_lea.sflag [#allocation3], %s148_s27  ;;  %s1287_s6 = scalar_lea.hbm %s1531_s4, 128 }
  0x32   : > { %p1288_p13 = scmp.ne.s32.totalorder %s1531_s4, %s1287_s6  ;;  %p1289_p0 = pneg %p1533_p11 }
  0x33   : > { %s1292_s9 = scalar_lea.hbm %s1683_s0, 256  ;;  %p1293_p7 = scmp.lt.u32.totalorder %s1531_s4, %s1683_s0 }
  0x34   : > { %p1290_p3 = pnand %p1289_p0, %p1288_p13  ;;  %p1294_p9 = scmp.lt.u32.totalorder %s1292_s9, %s1287_s6 }
  0x35   : > { %p1296_p1 = scmp.lt.u32.totalorder %s1287_s6, %s1531_s4 }
  0x36   : > { %p1291_p5 = pneg %p1290_p3  ;;  %p1295_p2 = por %p1294_p9, %p1293_p7 }
  0x38   : > { %p1297_p4 = por %p1296_p1, %p1295_p2 }
  0x3a   : > { %p1298_p6 = pnand %p1297_p4, %p1291_p5 }
  0x3c   : > { %1301 = shalt.err (!%p1298_p6)
}
  0x3d   : > { %s1302_s27 = scalar_lea.vmem %s1537_s25, 128  ;;  %s1392_s28 = smov [#allocation2]  }
  0x3e   : > { %p1303_p8 = scmp.ne.s32.totalorder %s1537_s25, %s1302_s27  ;;  %s1307_s29 = sshll.u32 %s1392_s28, 4  ;;  %s1308_s29 = int_to_ptr.vmem [resolvable:$false] %s1307_s29 }
  0x3f   : > { %s1309_s23 = scalar_lea.vmem %s1308_s29, 256  ;;  %p1310_p3 = scmp.lt.s32.totalorder %s1537_s25, %s1308_s29 }
  0x40   : > { %p1305_p10 = pnand %p1303_p8, %p1289_p0  ;;  %p1311_p7 = scmp.lt.s32.totalorder %s1309_s23, %s1302_s27 }
  0x42   : > { %p1306_p13 = pneg %p1305_p10  ;;  %p1312_p9 = por %p1311_p7, %p1310_p3 }
  0x44   : > { %p1313_p2 = pnand %p1312_p9, %p1306_p13 }
  0x46   : > { %1316 = shalt.err (!%p1313_p2)
}
  0x47   : > { %1182 = dma.hbm_to_vmem [thread:$0]  (!%p1533_p11), %s1531_s4, 128, %s1537_s25, %s149_s5  }
  0x48   : > { %p1697_p5 = scmp.ne.s32.totalorder %s1692_s20, 0 }
  0x49   : > { %s1567_s30 = sand.u32 (!%p1697_p5), 1, %s1379_s13   ;;  %p1698_p0 = scmp.ne.s32.totalorder (!%p1697_p5), %s1690_s18, 0 }
  0x4a   : > { %168 = sbr.rel (%p1697_p5) target bundleno = 1194 (0x4aa), region = 32  ;;  %s1068_s22 = sshll.u32 (!%p1697_p5), %s1567_s30, 3 }
  0x4b   : > { %s171_s6 = scalar_lea.sflag (!%p1697_p5), [#allocation3], %s1567_s30  ;;  %s174_s7 = scalar_lea.vmem (!%p1697_p5), [#allocation2], %s1068_s22 }
  0x51   : > { %1362 = dma.done.wait (%p1698_p0), %s171_s6, 128  }
  0x52   : > { %1364 = vsyncadd (%p1698_p0), %s171_s6, 4294967168  ;;  %p1699_p11 = scmp.eq.s32.totalorder %s1452_s16, 0 }
  0x54   : > { %1366 = dma.done.wait (%p1699_p11), [#allocation6], 512   ;;  %p1700_p1 = pmov %p1699_p11 }
  0x55   : > { %v1393_v0 = vmov 0.0|0.0   ;;  %vm1394_vm0 = vmmov 0   ;;  %v1395_v1 = vmov 0.0   ;;  %v202_v2 = vld [vmem:[#allocation5] sm:$0xff]  ;;  %v203_v3 = vld [vmem:[#allocation5 + $0x8] sm:$0xff]  ;;  %v204_v4 = vld [vmem:[#allocation5 + $0x10] sm:$0xff] }
  0x56   : > { %1368 = vsyncadd (%p1700_p1), [#allocation6], 4294966784  ;;  %1161 = vmatprep.subr.bf16.mxu0 %v1393_v0  ;;  %1118 = vmatprep.mubr.msk.f32.mxu0 %vm1394_vm0, %v1395_v1  ;;  %v1162_v5 = vpack.c.bf16 %v203_v3, %v202_v2  ;;  %v205_v6 = vld [vmem:[#allocation5 + $0x18] sm:$0xff]  ;;  %vm213_vm1 = vcmask 261120   ;;  %v1071_v9 = vld [vmem:[%s1685_s2] ss:$0 sm:$0xff] }
  0x57   : > { %1121 = vmatprep.subr.mxu1 %v1395_v1  ;;  %1123 = vmatprep.mubr.msk.f32.mxu1 %vm1394_vm0, %v1395_v1  ;;  %v1165_v7 = vpack.c.bf16 %v205_v6, %v204_v4  ;;  %v201_v8 = vld [vmem:[%s174_s7] sm:$0xff]  ;;  %s1396_s4 = smov 96   ;;  %s1397_s25 = smov 120   ;;  %vm291_vm2 = vcmask 64512   ;;  %vm962_vm3 = vcmask 130048   ;;  %vm964_vm4 = vcmask 195584  }
  0x58   : > { %1163 = vmatpush3.bf16.msra.mxu0 %v1162_v5  ;;  %s1398_s26 = smov 88   ;;  %s1399_s5 = smov 80  }
  0x59   : > { %1164 = vmatprep.subr.bf16.mxu0 %v1393_v0  ;;  %s1400_s8 = smov 112   ;;  %s1401_s9 = smov 72  }
  0x5a   : > { %s1402_s10 = smov 104   ;;  %s1403_s11 = smov 56  }
  0x5b   : > { %s1404_s27 = smov 64   ;;  %s1405_s28 = smov 40  }
  0x5c   : > { %1166 = vmatpush3.bf16.msra.mxu0 %v1165_v7  ;;  %s1406_s29 = smov 48   ;;  %s1407_s23 = smov 8  }
  0x5d   : > { %1131 = vmatprep.subr.mxu0 %v1395_v1  ;;  %s1408_s6 = smov 16   ;;  %s1409_s7 = smov 24  }
  0x5e   : > { %s1086_s18 = sshll.u32 %s1452_s16, 7  ;;  %s200_s20 = scalar_lea.vmem [#allocation7], %s1068_s22 }
  0x5f   : > { %1119 = vmatmul.mubr.msk.f32.vlgmr.msra.gmra.mrb[0].mxu0 %vm213_vm1, %v201_v8  ;;  %s968_s16 = scalar_lea.sflag [#allocation4], %s1567_s30 }
  0x60   : > { %1133 = vmatprep.mubr.msk.f32.mxu0 %vm1394_vm0, %v1395_v1 }
 0x132   : > { %v283_v10 = vpop.f32.mrb[0].mxu0 }
 0x133   : > { %v284_v11 = vadd.f32 %v1071_v9, %v283_v10  ;;  %v1120_v12 = vpop.f32.mrb[1].mxu0 }
 0x135   : > { %289 = vrot.lane.b32.xlu0 %v284_v11, %s1396_s4  ;;  %v287_v13 = vmul.f32 0.35355338, %v284_v11  ;;  %s981_s4 = sshll.u32 %s200_s20, 4  ;;  %s1640_s4 = int_to_ptr.vmem [resolvable:$true] %s981_s4 }
 0x136   : > { %s1317_s22 = scalar_lea.vmem %s1640_s4, 128 }
 0x137   : > { %454 = vrot.lane.b32.xlu1 %v287_v13, %s1397_s25  ;;  %p1318_p4 = scmp.ne.s32.totalorder %s1640_s4, %s1317_s22 }
 0x139   : > { %456 = vrot.lane.b32.xlu0 %v284_v11, %s1398_s26  ;;  %p1319_p6 = pnand %p1318_p4, %p1522_p12 }
 0x13b   : > { %621 = vrot.lane.b32.xlu1 %v284_v11, %s1399_s5  ;;  %s1638_s5 = scalar_lea.hbm %s1686_s3, %s1086_s18  ;;  %p1320_p8 = pneg %p1319_p6 }
 0x13d   : > { %619 = vrot.lane.b32.xlu0 %v287_v13, %s1400_s8  ;;  %s1410_s8 = smov [#allocation7]  }
 0x13f   : > { %786 = vrot.lane.b32.xlu1 %v284_v11, %s1401_s9  ;;  %s1321_s9 = sshll.u32 %s1410_s8, 4  ;;  %s1322_s9 = int_to_ptr.vmem [resolvable:$false] %s1321_s9 }
 0x140   : > { %p1324_p10 = scmp.lt.s32.totalorder %s1640_s4, %s1322_s9 }
 0x141   : > { %784 = vrot.lane.b32.xlu0 %v287_v13, %s1402_s10  ;;  %s1323_s10 = scalar_lea.vmem %s1322_s9, 256 }
 0x142   : > { %p1325_p13 = scmp.lt.s32.totalorder %s1323_s10, %s1317_s22 }
 0x144   : > { %p1326_p3 = por %p1325_p13, %p1324_p10 }
 0x146   : > { %p1327_p7 = pnand %p1326_p3, %p1320_p8 }
 0x1a7   : > { %v290_v14 = vpop.permute.xlu0 %289 }
 0x1a8   : > { %1122 = vmatpush3.xpose.msk.msra.mxu1 %vm291_vm2, %v290_v14 }
 0x1a9   : > { %v455_v15 = vpop.permute.xlu1 %454  ;;  %1126 = vmatprep.subr.mxu1 %v1395_v1 }
 0x1ab   : > { %v457_v16 = vpop.permute.xlu0 %456  ;;  %1124 = vmatmul.mubr.msk.f32.vlgmr.msra.gmra.mrb[0].mxu1 %vm291_vm2, %v287_v13 }
 0x1ac   : > { %1132 = vmatpush3.xpose.msk.msra.mxu0 %vm291_vm2, %v457_v16  ;;  %1128 = vmatprep.mubr.msk.f32.mxu1 %vm1394_vm0, %v1395_v1 }
 0x1ad   : > { %v622_v17 = vpop.permute.xlu1 %621  ;;  %1141 = vmatprep.subr.mxu0 %v1395_v1 }
 0x1af   : > { %1134 = vmatmul.mubr.msk.f32.vlgmr.msra.gmra.mrb[2].mxu0 %vm291_vm2, %v455_v15  ;;  %v620_v18 = vpop.permute.xlu0 %619 }
 0x1b0   : > { %1142 = vmatpush3.xpose.msk.msra.mxu0 %vm291_vm2, %v622_v17  ;;  %1143 = vmatprep.mubr.msk.f32.mxu0 %vm1394_vm0, %v1395_v1 }
 0x1b1   : > { %1151 = vmatprep.subr.mxu0 %v1395_v1  ;;  %v787_v19 = vpop.permute.xlu1 %786 }
 0x1b3   : > { %1144 = vmatmul.mubr.msk.f32.vlgmr.msra.gmra.mrb[4].mxu0 %vm291_vm2, %v620_v18  ;;  %v785_v20 = vpop.permute.xlu0 %784 }
 0x1b4   : > { %1152 = vmatpush3.xpose.msk.msra.mxu0 %vm291_vm2, %v787_v19  ;;  %1153 = vmatprep.mubr.msk.f32.mxu0 %vm1394_vm0, %v1395_v1 }
 0x1b7   : > { %1154 = vmatmul.mubr.msk.f32.vlgmr.msra.gmra.mrb[6].mxu0 %vm291_vm2, %v785_v20 }
 0x27e   : > { %v363_v21 = vpop.f32.mrb[0].mxu1 }
 0x27f   : > { %v1125_v22 = vpop.f32.mrb[1].mxu1  ;;  %v367_v23 = vsel %vm291_vm2, %v363_v21, -inf }
 0x280   : > { %368 = vmax.xlane.f32.xlu1 %v367_v23 }
 0x282   : > { %v528_v24 = vpop.f32.mrb[2].mxu0 }
 0x283   : > { %v1135_v25 = vpop.f32.mrb[3].mxu0  ;;  %v532_v26 = vsel %vm291_vm2, %v528_v24, -inf }
 0x284   : > { %533 = vmax.xlane.f32.xlu0 %v532_v26 }
 0x286   : > { %v693_v27 = vpop.f32.mrb[4].mxu0 }
 0x287   : > { %v1145_v28 = vpop.f32.mrb[5].mxu0  ;;  %v697_v29 = vsel %vm291_vm2, %v693_v27, -inf }
 0x288   : > { %698 = vmax.xlane.f32.xlu0 %v697_v29 }
 0x28a   : > { %v858_v30 = vpop.f32.mrb[6].mxu0 }
 0x28b   : > { %v1155_v31 = vpop.f32.mrb[7].mxu0  ;;  %v862_v32 = vsel %vm291_vm2, %v858_v30, -inf }
 0x291   : > { %541 = vrot.lane.b32.xlu1 %v284_v11, %s1403_s11 }
 0x29e   : > { %376 = vrot.lane.b32.xlu0 %v284_v11, %s1404_s27 }
 0x2a2   : > { %871 = vrot.lane.b32.xlu0 %v284_v11, %s1405_s28 }
 0x2b5   : > { %863 = vmax.xlane.f32.xlu1 %v862_v32 }
 0x2c6   : > { %706 = vrot.lane.b32.xlu1 %v284_v11, %s1406_s29 }
 0x30d   : > { %v369_v33 = vpop.xlane.xlu1 %368 }
 0x30e   : > { %v370_v34 = vsub.f32 %v363_v21, %v369_v33 }
 0x310   : > { %v371_v35 = vmul.f32 1.442695, %v370_v34 }
 0x311   : > { %v534_v36 = vpop.xlane.xlu0 %533  ;;  %v542_v44 = vpop.permute.xlu1 %541 }
 0x312   : > { %1243 = vpow2.f32 %v371_v35  ;;  %v535_v37 = vsub.f32 %v528_v24, %v534_v36 }
 0x314   : > { %v536_v38 = vmul.f32 1.442695, %v535_v37 }
 0x315   : > { %v699_v39 = vpop.xlane.xlu0 %698 }
 0x316   : > { %1245 = vpow2.f32 %v536_v38  ;;  %v700_v40 = vsub.f32 %v693_v27, %v699_v39 }
 0x318   : > { %v701_v41 = vmul.f32 1.442695, %v700_v40 }
 0x319   : > { %v377_v42 = vpop.permute.xlu0 %376 }
 0x31a   : > { %1247 = vpow2.f32 %v701_v41  ;;  %1127 = vmatpush3.msra.mxu1 %v377_v42 }
 0x31b   : > { %1136 = vmatprep.subr.mxu1 %v1395_v1 }
 0x31c   : > { %v1244_v43 = vpop.eup %1243 }
 0x31d   : > { %1129 = vmatmul.mubr.msk.f32.vlgmr.msra.gmra.mrb[2].mxu1 %vm291_vm2, %v1244_v43  ;;  %v373_v49 = vsel %vm291_vm2, %v1244_v43, 0.0  ;;  %v872_v54 = vpop.permute.xlu0 %871 }
 0x31e   : > { %1137 = vmatpush3.msra.mxu1 %v542_v44  ;;  %1138 = vmatprep.mubr.msk.f32.mxu1 %vm1394_vm0, %v1395_v1 }
 0x31f   : > { %1146 = vmatprep.subr.mxu1 %v1395_v1 }
 0x320   : > { %v1246_v45 = vpop.eup %1245 }
 0x321   : > { %1139 = vmatmul.mubr.msk.f32.vlgmr.msra.gmra.mrb[4].mxu1 %vm291_vm2, %v1246_v45  ;;  %v538_v46 = vsel %vm291_vm2, %v1246_v45, 0.0 }
 0x322   : > { %539 = vadd.xlane.f32.xlu1 %v538_v46  ;;  %1148 = vmatprep.mubr.msk.f32.mxu1 %vm1394_vm0, %v1395_v1 }
 0x324   : > { %v1248_v47 = vpop.eup %1247 }
 0x325   : > { %v703_v48 = vsel %vm291_vm2, %v1248_v47, 0.0 }
 0x326   : > { %704 = vadd.xlane.f32.xlu0 %v703_v48  ;;  %374 = vadd.xlane.f32.xlu1 %v373_v49 }
 0x342   : > { %v864_v50 = vpop.xlane.xlu1 %863 }
 0x343   : > { %v865_v51 = vsub.f32 %v858_v30, %v864_v50 }
 0x345   : > { %v866_v52 = vmul.f32 1.442695, %v865_v51 }
 0x346   : > { %v707_v53 = vpop.permute.xlu1 %706 }
 0x347   : > { %1249 = vpow2.f32 %v866_v52  ;;  %1147 = vmatpush3.msra.mxu1 %v707_v53 }
 0x348   : > { %1149 = vmatmul.mubr.msk.f32.vlgmr.msra.gmra.mrb[6].mxu1 %vm291_vm2, %v1248_v47  ;;  %1156 = vmatprep.subr.mxu1 %v1395_v1 }
 0x349   : > { %1157 = vmatpush3.msra.mxu1 %v872_v54  ;;  %1158 = vmatprep.mubr.msk.f32.mxu1 %vm1394_vm0, %v1395_v1 }
 0x351   : > { %v1250_v55 = vpop.eup %1249 }
 0x352   : > { %1159 = vmatmul.mubr.msk.f32.vlgmr.msra.gmra.mrb[8].mxu1 %vm291_vm2, %v1250_v55  ;;  %v868_v56 = vsel %vm291_vm2, %v1250_v55, 0.0 }
 0x353   : > { %869 = vadd.xlane.f32.xlu0 %v868_v56 }
 0x3af   : > { %v540_v57 = vpop.xlane.xlu1 %539 }
 0x3b0   : > { %1251 = vrcp.f32 %v540_v57 }
 0x3b3   : > { %v705_v0 = vpop.xlane.xlu0 %704  ;;  %v375_v10 = vpop.xlane.xlu1 %374 }
 0x3b4   : > { %1253 = vrcp.f32 %v705_v0 }
 0x3ba   : > { %v1252_v60 = vpop.eup %1251 }
 0x3be   : > { %v1254_v1 = vpop.eup %1253 }
 0x3e0   : > { %v870_v2 = vpop.xlane.xlu0 %869 }
 0x3e1   : > { %1255 = vrcp.f32 %v870_v2 }
 0x3e2   : > { %1257 = vrcp.f32 %v375_v10 }
 0x3eb   : > { %v1256_v6 = vpop.eup %1255 }
 0x3ec   : > { %v1258_v11 = vpop.eup %1257 }
 0x3f0   : > { %v448_v58 = vpop.f32.mrb[2].mxu1 }
 0x3f1   : > { %v1130_v59 = vpop.f32.mrb[3].mxu1  ;;  %v453_v14 = vmul.f32 %v1258_v11, %v448_v58 }
 0x3f4   : > { %v613_v61 = vpop.f32.mrb[4].mxu1 }
 0x3f5   : > { %v618_v62 = vmul.f32 %v1252_v60, %v613_v61  ;;  %v1140_v63 = vpop.f32.mrb[5].mxu1 }
 0x3f7   : > { %950 = vrot.lane.b32.xlu0 %v618_v62, %s1407_s23 }
 0x41b   : > { %v778_v3 = vpop.f32.mrb[6].mxu1 }
 0x41c   : > { %v783_v4 = vmul.f32 %v1254_v1, %v778_v3  ;;  %v1150_v5 = vpop.f32.mrb[7].mxu1 }
 0x41e   : > { %954 = vrot.lane.b32.xlu1 %v783_v4, %s1408_s6 }
 0x425   : > { %v943_v7 = vpop.f32.mrb[8].mxu1 }
 0x426   : > { %v948_v8 = vmul.f32 %v1256_v6, %v943_v7  ;;  %v1160_v9 = vpop.f32.mrb[9].mxu1 }
 0x428   : > { %958 = vrot.lane.b32.xlu1 %v948_v8, %s1409_s7 }
 0x469   : > { %v951_v12 = vpop.permute.xlu0 %950 }
 0x46a   : > { %v961_v15 = vsel %vm291_vm2, %v453_v14, %v951_v12 }
 0x490   : > { %v955_v13 = vpop.permute.xlu1 %954 }
 0x491   : > { %v963_v16 = vsel %vm962_vm3, %v961_v15, %v955_v13 }
 0x49a   : > { %v959_v17 = vpop.permute.xlu1 %958 }
 0x49b   : > { %v965_v18 = vsel %vm964_vm4, %v963_v16, %v959_v17 }
 0x49c   : > { %966 = vst.msk [vmem:[%s200_s20] sm:$0xff] %vm213_vm1, %v965_v18 }
 0x49d   : > { %1330 = shalt.err (!%p1327_p7)
}
 0x49e   : > { %s1331_s30 = scalar_lea.hbm %s1638_s5, 128  ;;  %s1335_s28 = scalar_lea.hbm %s1686_s3, 256 }
 0x49f   : > { %p1332_p9 = scmp.ne.s32.totalorder %s1638_s5, %s1331_s30  ;;  %p1336_p0 = scmp.lt.u32.totalorder %s1638_s5, %s1686_s3 }
 0x4a0   : > { %p1337_p11 = scmp.lt.u32.totalorder %s1335_s28, %s1331_s30  ;;  %p1339_p4 = scmp.lt.u32.totalorder %s1331_s30, %s1638_s5 }
 0x4a1   : > { %p1333_p2 = pnand %p1332_p9, %p1522_p12 }
 0x4a2   : > { %p1338_p1 = por %p1337_p11, %p1336_p0 }
 0x4a3   : > { %p1334_p5 = pneg %p1333_p2 }
 0x4a4   : > { %p1340_p6 = por %p1339_p4, %p1338_p1 }
 0x4a6   : > { %p1341_p8 = pnand %p1340_p6, %p1334_p5 }
 0x4a8   : > { %1344 = shalt.err (!%p1341_p8)
}
 0x4a9   : > { %1173 = dma.vmem_to_hbm [thread:$0]  (%p1522_p12), %s1640_s4, 128, %s1638_s5, %s968_s16  }
 0x4aa PF: > { %s993_s6 = sand.u32 1, %s1375_s12   ;;  %p1701_p10 = scmp.ne.s32.totalorder %s1691_s19, 0 }
 0x4ab   : > { %p1702_p13 = scmp.ge.s32.totalorder %s1387_s15, 2  ;;  %s994_s7 = scalar_lea.sflag [#allocation4], %s993_s6 }
 0x4ad   : > { %p1184_p3 = pnand %p1702_p13, %p1701_p10 }
 0x4af   : > { %1370 = dma.done.wait (!%p1184_p3), %s994_s7, 128  }
 0x4b0   : > { %1372 = vsyncadd (!%p1184_p3), %s994_s7, 4294967168  ;;  %p17_p7 = scmp.ge.s32.totalorder %s1487_s24, 4   ;;  %s1703_s12 = smov %s1379_s13 }
 0x4b1   : > { %s1704_s13 = smov %s1383_s14  ;;  %s1705_s14 = smov %s1518_s17 }
 0x4b2   : > { %s1706_s15 = smov %s1487_s24  ;;  %19 = sbr.rel (!%p17_p7) target bundleno = 6 (0x6), region = 81 }
 0x4b9   :  { %999 = vsyncpa [#allocation3], 1 }
 0x4ba   :  { %1001 = vsyncpa [#allocation3 + $0x1], 1 }
 0x4bb   :  { %1002 = vsyncpa [#allocation6], 1 }
 0x4bc   :  { %1003 = vsyncpa [#allocation4], 1 }
 0x4bd   :  { %1005 = vsyncpa [#allocation4 + $0x1], 1 }

// kernel: tpu_custom_call.1
= control target key start
LH: loop header
LB: loop body
LE: loop exit
PB: predicated region body
PF: predicated region fallthrough
CT: control target
= control target key end

     0   :  { %8 = vsyncpa [#allocation3], 0  ;;  %s1683_s0 = inlined_call_operand.hbm [shape: f32[2,8,32], index: 0, kind: input, shape index: {}]   ;;  %s1684_s1 = inlined_call_operand.hbm [shape: f32[32,96], index: 1, kind: input, shape index: {}]   ;;  %s1685_s2 = inlined_call_operand.vmem [shape: f32[1,96], index: 2, kind: input, shape index: {}]   ;;  %s1686_s3 = inlined_call_operand.hbm [shape: f32[2,8,32], index: 3, kind: output, shape index: {}]  }
   0x1   :  { %10 = vsyncpa [#allocation3 + $0x1], 0 }
   0x2   :  { %11 = vsyncpa [#allocation6], 0 }
   0x3   :  { %12 = vsyncpa [#allocation4], 0 }
   0x4   :  { %14 = vsyncpa [#allocation4 + $0x1], 0  ;;  %s1431_s12 = smov 0   ;;  %s1433_s13 = smov 0  }
   0x5   :  { %s1435_s14 = smov 0   ;;  %s1437_s15 = smov 0  }
   0x6 LB: > { %s1452_s16 = sadd.s32 4294967295, %s1387_s15   ;;  %s1061_s17 = sadd.s32 4294967294, %s1387_s15   ;;  %s1387_s15 = sphi %s1437_s15, %s1706_s15   ;;  %s1383_s14 = sphi %s1435_s14, %s1705_s14   ;;  %s1379_s13 = sphi %s1433_s13, %s1704_s13   ;;  %s1375_s12 = sphi %s1431_s12, %s1703_s12  }
   0x7   : > { %p40_p0 = scmp.ne.s32.totalorder %s1379_s13, %s1375_s12  ;;  %p1687_p1 = scmp.eq.s32.totalorder %s1452_s16, 0 }
   0x8   : > { %p112_p3 = scmp.eq.s32.totalorder %s1061_s17, 1  ;;  %p1062_p5 = scmp.ge.s32.totalorder %s1387_s15, 1 }
   0x9   : > { %p1461_p4 = por %p1687_p1, %p40_p0  ;;  %p119_p7 = scmp.lt.s32.totalorder %s1387_s15, 3 }
   0xa   : > { %p1466_p6 = por %p112_p3, %p40_p0  ;;  %s1389_s21 = smov [#allocation5]  }
   0xb   : > { %s1690_s18 = scalar_select %p1461_p4, 1, 0 }
   0xc   : > { %s1691_s19 = scalar_select %p1466_p6, 1, 0 }
   0xd   : > { %p1471_p8 = pnand %p1062_p5, %p119_p7  ;;  %s131_s22 = sshll.u32 %s1389_s21, 4  ;;  %s1475_s22 = int_to_ptr.vmem [resolvable:$true] %s131_s22 }
   0xe   : > { %s1487_s24 = sadd.s32 1, %s1387_s15   ;;  %s27_s25 = sadd.s32 1, %s1383_s14 }
   0xf   : > { %s1692_s20 = scalar_select %p1471_p8, 1, 0 }
  0x10   : > { %p1175_p9 = pneg %p1471_p8  ;;  %s24_s26 = ssub.s32 %s1387_s15, %s1487_s24 }
  0x11   : > { %s1259_s29 = scalar_lea.hbm %s1684_s1, 512 }
  0x12   : > { %p1482_p11 = pnand %p1175_p9, %p1687_p1  ;;  %p1260_p12 = scmp.ne.s32.totalorder %s1684_s1, %s1259_s29 }
  0x13   : > { %p1266_p5 = scmp.lt.u32.totalorder %s1259_s29, %s1684_s1 }
  0x14   : > { %p1261_p13 = pneg %p1482_p11 }
  0x16   : > { %p1262_p0 = pnand %p1261_p13, %p1260_p12 }
  0x18   : > { %p1263_p3 = pneg %p1262_p0 }
  0x1a   : > { %p1268_p7 = pnand %p1266_p5, %p1263_p3 }
  0x1c   : > { %1271 = shalt.err (!%p1268_p7)
}
  0x1d   : > { %s1272_s7 = scalar_lea.vmem %s1475_s22, 512  ;;  %p1280_p2 = scmp.lt.s32.totalorder %s1475_s22, %s1475_s22 }
  0x1e   : > { %p1273_p9 = scmp.ne.s32.totalorder %s1475_s22, %s1272_s7  ;;  %p1281_p6 = scmp.lt.s32.totalorder %s1272_s7, %s1272_s7 }
  0x20   : > { %p1275_p10 = pnand %p1273_p9, %p1261_p13  ;;  %p1282_p4 = por %p1281_p6, %p1280_p2 }
  0x22   : > { %p1276_p1 = pneg %p1275_p10 }
  0x24   : > { %p1283_p8 = pnand %p1282_p4, %p1276_p1 }
  0x26   : > { %1286 = shalt.err (!%p1283_p8)
}
  0x27   : > { %s1390_s8 = smov 128   ;;  %s1391_s9 = smov 8  }
  0x28   : > { %1178 = dma.hbm_to_vmem [thread:$0]  (!%p1482_p11), %s1684_s1, 512, %s1475_s22, [#allocation6], %s1390_s8, %s1390_s8, %s1391_s9  }
  0x29   : > { %p25_p2 = scmp.eq.s32.totalorder %s24_s26, 0  ;;  %p34_p1 = scmp.ne.s32.totalorder %s1383_s14, %s1379_s13 }
  0x2a   : > { %p35_p4 = scmp.eq.s32.totalorder %s1387_s15, 0  ;;  %p1188_p6 = scmp.lt.s32.totalorder %s1387_s15, 2 }
  0x2b   : > { %s1518_s17 = scalar_select %p25_p2, %s1383_s14, %s27_s25  }
  0x2c   : > { %p36_p8 = por %p35_p4, %p34_p1  ;;  %p1694_p10 = scmp.eq.s32.totalorder %s1452_s16, 1 }
  0x2d   : > { %s148_s27 = sand.u32 1, %s1383_s14   ;;  %s1066_s28 = sshll.u32 %s1387_s15, 7 }
  0x2e   : > { %p1522_p12 = por %p1694_p10, %p34_p1  ;;  %s1065_s29 = sshll.u32 %s148_s27, 3 }
  0x2f   : > { %s1531_s4 = scalar_lea.hbm %s1683_s0, %s1066_s28  ;;  %s152_s22 = scalar_lea.vmem [#allocation2], %s1065_s29 }
  0x30   : > { %s159_s25 = sshll.u32 %s152_s22, 4  ;;  %p1533_p11 = pnand %p1188_p6, %p36_p8  ;;  %s1537_s25 = int_to_ptr.vmem [resolvable:$true] %s159_s25 }
  0x31   : > { %s149_s5 = scalar_lea.sflag [#allocation3], %s148_s27  ;;  %s1287_s6 = scalar_lea.hbm %s1531_s4, 128 }
  0x32   : > { %p1288_p13 = scmp.ne.s32.totalorder %s1531_s4, %s1287_s6  ;;  %p1289_p0 = pneg %p1533_p11 }
  0x33   : > { %s1292_s9 = scalar_lea.hbm %s1683_s0, 256  ;;  %p1293_p7 = scmp.lt.u32.totalorder %s1531_s4, %s1683_s0 }
  0x34   : > { %p1290_p3 = pnand %p1289_p0, %p1288_p13  ;;  %p1294_p9 = scmp.lt.u32.totalorder %s1292_s9, %s1287_s6 }
  0x35   : > { %p1296_p1 = scmp.lt.u32.totalorder %s1287_s6, %s1531_s4 }
  0x36   : > { %p1291_p5 = pneg %p1290_p3  ;;  %p1295_p2 = por %p1294_p9, %p1293_p7 }
  0x38   : > { %p1297_p4 = por %p1296_p1, %p1295_p2 }
  0x3a   : > { %p1298_p6 = pnand %p1297_p4, %p1291_p5 }
  0x3c   : > { %1301 = shalt.err (!%p1298_p6)
}
  0x3d   : > { %s1302_s27 = scalar_lea.vmem %s1537_s25, 128  ;;  %s1392_s28 = smov [#allocation2]  }
  0x3e   : > { %p1303_p8 = scmp.ne.s32.totalorder %s1537_s25, %s1302_s27  ;;  %s1307_s29 = sshll.u32 %s1392_s28, 4  ;;  %s1308_s29 = int_to_ptr.vmem [resolvable:$false] %s1307_s29 }
  0x3f   : > { %s1309_s23 = scalar_lea.vmem %s1308_s29, 256  ;;  %p1310_p3 = scmp.lt.s32.totalorder %s1537_s25, %s1308_s29 }
  0x40   : > { %p1305_p10 = pnand %p1303_p8, %p1289_p0  ;;  %p1311_p7 = scmp.lt.s32.totalorder %s1309_s23, %s1302_s27 }
  0x42   : > { %p1306_p13 = pneg %p1305_p10  ;;  %p1312_p9 = por %p1311_p7, %p1310_p3 }
  0x44   : > { %p1313_p2 = pnand %p1312_p9, %p1306_p13 }
  0x46   : > { %1316 = shalt.err (!%p1313_p2)
}
  0x47   : > { %1182 = dma.hbm_to_vmem [thread:$0]  (!%p1533_p11), %s1531_s4, 128, %s1537_s25, %s149_s5  }
  0x48   : > { %p1697_p5 = scmp.ne.s32.totalorder %s1692_s20, 0 }
  0x49   : > { %s1567_s30 = sand.u32 (!%p1697_p5), 1, %s1379_s13   ;;  %p1698_p0 = scmp.ne.s32.totalorder (!%p1697_p5), %s1690_s18, 0 }
  0x4a   : > { %168 = sbr.rel (%p1697_p5) target bundleno = 1194 (0x4aa), region = 32  ;;  %s1068_s22 = sshll.u32 (!%p1697_p5), %s1567_s30, 3 }
  0x4b   : > { %s171_s6 = scalar_lea.sflag (!%p1697_p5), [#allocation3], %s1567_s30  ;;  %s174_s7 = scalar_lea.vmem (!%p1697_p5), [#allocation2], %s1068_s22 }
  0x51   : > { %1362 = dma.done.wait (%p1698_p0), %s171_s6, 128  }
  0x52   : > { %1364 = vsyncadd (%p1698_p0), %s171_s6, 4294967168  ;;  %p1699_p11 = scmp.eq.s32.totalorder %s1452_s16, 0 }
  0x54   : > { %1366 = dma.done.wait (%p1699_p11), [#allocation6], 512   ;;  %p1700_p1 = pmov %p1699_p11 }
  0x55   : > { %v1393_v0 = vmov 0.0|0.0   ;;  %vm1394_vm0 = vmmov 0   ;;  %v1395_v1 = vmov 0.0   ;;  %v202_v2 = vld [vmem:[#allocation5] sm:$0xff]  ;;  %v203_v3 = vld [vmem:[#allocation5 + $0x8] sm:$0xff]  ;;  %v204_v4 = vld [vmem:[#allocation5 + $0x10] sm:$0xff] }
  0x56   : > { %1368 = vsyncadd (%p1700_p1), [#allocation6], 4294966784  ;;  %1161 = vmatprep.subr.bf16.mxu0 %v1393_v0  ;;  %1118 = vmatprep.mubr.msk.f32.mxu0 %vm1394_vm0, %v1395_v1  ;;  %v1162_v5 = vpack.c.bf16 %v203_v3, %v202_v2  ;;  %v205_v6 = vld [vmem:[#allocation5 + $0x18] sm:$0xff]  ;;  %vm213_vm1 = vcmask 261120   ;;  %v1071_v9 = vld [vmem:[%s1685_s2] ss:$0 sm:$0xff] }
  0x57   : > { %1121 = vmatprep.subr.mxu1 %v1395_v1  ;;  %1123 = vmatprep.mubr.msk.f32.mxu1 %vm1394_vm0, %v1395_v1  ;;  %v1165_v7 = vpack.c.bf16 %v205_v6, %v204_v4  ;;  %v201_v8 = vld [vmem:[%s174_s7] sm:$0xff]  ;;  %s1396_s4 = smov 96   ;;  %s1397_s25 = smov 120   ;;  %vm291_vm2 = vcmask 64512   ;;  %vm962_vm3 = vcmask 130048   ;;  %vm964_vm4 = vcmask 195584  }
  0x58   : > { %1163 = vmatpush3.bf16.msra.mxu0 %v1162_v5  ;;  %s1398_s26 = smov 88   ;;  %s1399_s5 = smov 80  }
  0x59   : > { %1164 = vmatprep.subr.bf16.mxu0 %v1393_v0  ;;  %s1400_s8 = smov 112   ;;  %s1401_s9 = smov 72  }
  0x5a   : > { %s1402_s10 = smov 104   ;;  %s1403_s11 = smov 56  }
  0x5b   : > { %s1404_s27 = smov 64   ;;  %s1405_s28 = smov 40  }
  0x5c   : > { %1166 = vmatpush3.bf16.msra.mxu0 %v1165_v7  ;;  %s1406_s29 = smov 48   ;;  %s1407_s23 = smov 8  }
  0x5d   : > { %1131 = vmatprep.subr.mxu0 %v1395_v1  ;;  %s1408_s6 = smov 16   ;;  %s1409_s7 = smov 24  }
  0x5e   : > { %s1086_s18 = sshll.u32 %s1452_s16, 7  ;;  %s200_s20 = scalar_lea.vmem [#allocation7], %s1068_s22 }
  0x5f   : > { %1119 = vmatmul.mubr.msk.f32.vlgmr.msra.gmra.mrb[0].mxu0 %vm213_vm1, %v201_v8  ;;  %s968_s16 = scalar_lea.sflag [#allocation4], %s1567_s30 }
  0x60   : > { %1133 = vmatprep.mubr.msk.f32.mxu0 %vm1394_vm0, %v1395_v1 }
 0x132   : > { %v283_v10 = vpop.f32.mrb[0].mxu0 }
 0x133   : > { %v284_v11 = vadd.f32 %v1071_v9, %v283_v10  ;;  %v1120_v12 = vpop.f32.mrb[1].mxu0 }
 0x135   : > { %289 = vrot.lane.b32.xlu0 %v284_v11, %s1396_s4  ;;  %v287_v13 = vmul.f32 0.35355338, %v284_v11  ;;  %s981_s4 = sshll.u32 %s200_s20, 4  ;;  %s1640_s4 = int_to_ptr.vmem [resolvable:$true] %s981_s4 }
 0x136   : > { %s1317_s22 = scalar_lea.vmem %s1640_s4, 128 }
 0x137   : > { %454 = vrot.lane.b32.xlu1 %v287_v13, %s1397_s25  ;;  %p1318_p4 = scmp.ne.s32.totalorder %s1640_s4, %s1317_s22 }
 0x139   : > { %456 = vrot.lane.b32.xlu0 %v284_v11, %s1398_s26  ;;  %p1319_p6 = pnand %p1318_p4, %p1522_p12 }
 0x13b   : > { %621 = vrot.lane.b32.xlu1 %v284_v11, %s1399_s5  ;;  %s1638_s5 = scalar_lea.hbm %s1686_s3, %s1086_s18  ;;  %p1320_p8 = pneg %p1319_p6 }
 0x13d   : > { %619 = vrot.lane.b32.xlu0 %v287_v13, %s1400_s8  ;;  %s1410_s8 = smov [#allocation7]  }
 0x13f   : > { %786 = vrot.lane.b32.xlu1 %v284_v11, %s1401_s9  ;;  %s1321_s9 = sshll.u32 %s1410_s8, 4  ;;  %s1322_s9 = int_to_ptr.vmem [resolvable:$false] %s1321_s9 }
 0x140   : > { %p1324_p10 = scmp.lt.s32.totalorder %s1640_s4, %s1322_s9 }
 0x141   : > { %784 = vrot.lane.b32.xlu0 %v287_v13, %s1402_s10  ;;  %s1323_s10 = scalar_lea.vmem %s1322_s9, 256 }
 0x142   : > { %p1325_p13 = scmp.lt.s32.totalorder %s1323_s10, %s1317_s22 }
 0x144   : > { %p1326_p3 = por %p1325_p13, %p1324_p10 }
 0x146   : > { %p1327_p7 = pnand %p1326_p3, %p1320_p8 }
 0x1a7   : > { %v290_v14 = vpop.permute.xlu0 %289 }
 0x1a8   : > { %1122 = vmatpush3.xpose.msk.msra.mxu1 %vm291_vm2, %v290_v14 }
 0x1a9   : > { %v455_v15 = vpop.permute.xlu1 %454  ;;  %1126 = vmatprep.subr.mxu1 %v1395_v1 }
 0x1ab   : > { %v457_v16 = vpop.permute.xlu0 %456  ;;  %1124 = vmatmul.mubr.msk.f32.vlgmr.msra.gmra.mrb[0].mxu1 %vm291_vm2, %v287_v13 }
 0x1ac   : > { %1132 = vmatpush3.xpose.msk.msra.mxu0 %vm291_vm2, %v457_v16  ;;  %1128 = vmatprep.mubr.msk.f32.mxu1 %vm1394_vm0, %v1395_v1 }
 0x1ad   : > { %v622_v17 = vpop.permute.xlu1 %621  ;;  %1141 = vmatprep.subr.mxu0 %v1395_v1 }
 0x1af   : > { %1134 = vmatmul.mubr.msk.f32.vlgmr.msra.gmra.mrb[2].mxu0 %vm291_vm2, %v455_v15  ;;  %v620_v18 = vpop.permute.xlu0 %619 }
 0x1b0   : > { %1142 = vmatpush3.xpose.msk.msra.mxu0 %vm291_vm2, %v622_v17  ;;  %1143 = vmatprep.mubr.msk.f32.mxu0 %vm1394_vm0, %v1395_v1 }
 0x1b1   : > { %1151 = vmatprep.subr.mxu0 %v1395_v1  ;;  %v787_v19 = vpop.permute.xlu1 %786 }
 0x1b3   : > { %1144 = vmatmul.mubr.msk.f32.vlgmr.msra.gmra.mrb[4].mxu0 %vm291_vm2, %v620_v18  ;;  %v785_v20 = vpop.permute.xlu0 %784 }
 0x1b4   : > { %1152 = vmatpush3.xpose.msk.msra.mxu0 %vm291_vm2, %v787_v19  ;;  %1153 = vmatprep.mubr.msk.f32.mxu0 %vm1394_vm0, %v1395_v1 }
 0x1b7   : > { %1154 = vmatmul.mubr.msk.f32.vlgmr.msra.gmra.mrb[6].mxu0 %vm291_vm2, %v785_v20 }
 0x27e   : > { %v363_v21 = vpop.f32.mrb[0].mxu1 }
 0x27f   : > { %v1125_v22 = vpop.f32.mrb[1].mxu1  ;;  %v367_v23 = vsel %vm291_vm2, %v363_v21, -inf }
 0x280   : > { %368 = vmax.xlane.f32.xlu1 %v367_v23 }
 0x282   : > { %v528_v24 = vpop.f32.mrb[2].mxu0 }
 0x283   : > { %v1135_v25 = vpop.f32.mrb[3].mxu0  ;;  %v532_v26 = vsel %vm291_vm2, %v528_v24, -inf }
 0x284   : > { %533 = vmax.xlane.f32.xlu0 %v532_v26 }
 0x286   : > { %v693_v27 = vpop.f32.mrb[4].mxu0 }
 0x287   : > { %v1145_v28 = vpop.f32.mrb[5].mxu0  ;;  %v697_v29 = vsel %vm291_vm2, %v693_v27, -inf }
 0x288   : > { %698 = vmax.xlane.f32.xlu0 %v697_v29 }
 0x28a   : > { %v858_v30 = vpop.f32.mrb[6].mxu0 }
 0x28b   : > { %v1155_v31 = vpop.f32.mrb[7].mxu0  ;;  %v862_v32 = vsel %vm291_vm2, %v858_v30, -inf }
 0x291   : > { %541 = vrot.lane.b32.xlu1 %v284_v11, %s1403_s11 }
 0x29e   : > { %376 = vrot.lane.b32.xlu0 %v284_v11, %s1404_s27 }
 0x2a2   : > { %871 = vrot.lane.b32.xlu0 %v284_v11, %s1405_s28 }
 0x2b5   : > { %863 = vmax.xlane.f32.xlu1 %v862_v32 }
 0x2c6   : > { %706 = vrot.lane.b32.xlu1 %v284_v11, %s1406_s29 }
 0x30d   : > { %v369_v33 = vpop.xlane.xlu1 %368 }
 0x30e   : > { %v370_v34 = vsub.f32 %v363_v21, %v369_v33 }
 0x310   : > { %v371_v35 = vmul.f32 1.442695, %v370_v34 }
 0x311   : > { %v534_v36 = vpop.xlane.xlu0 %533  ;;  %v542_v44 = vpop.permute.xlu1 %541 }
 0x312   : > { %1243 = vpow2.f32 %v371_v35  ;;  %v535_v37 = vsub.f32 %v528_v24, %v534_v36 }
 0x314   : > { %v536_v38 = vmul.f32 1.442695, %v535_v37 }
 0x315   : > { %v699_v39 = vpop.xlane.xlu0 %698 }
 0x316   : > { %1245 = vpow2.f32 %v536_v38  ;;  %v700_v40 = vsub.f32 %v693_v27, %v699_v39 }
 0x318   : > { %v701_v41 = vmul.f32 1.442695, %v700_v40 }
 0x319   : > { %v377_v42 = vpop.permute.xlu0 %376 }
 0x31a   : > { %1247 = vpow2.f32 %v701_v41  ;;  %1127 = vmatpush3.msra.mxu1 %v377_v42 }
 0x31b   : > { %1136 = vmatprep.subr.mxu1 %v1395_v1 }
 0x31c   : > { %v1244_v43 = vpop.eup %1243 }
 0x31d   : > { %1129 = vmatmul.mubr.msk.f32.vlgmr.msra.gmra.mrb[2].mxu1 %vm291_vm2, %v1244_v43  ;;  %v373_v49 = vsel %vm291_vm2, %v1244_v43, 0.0  ;;  %v872_v54 = vpop.permute.xlu0 %871 }
 0x31e   : > { %1137 = vmatpush3.msra.mxu1 %v542_v44  ;;  %1138 = vmatprep.mubr.msk.f32.mxu1 %vm1394_vm0, %v1395_v1 }
 0x31f   : > { %1146 = vmatprep.subr.mxu1 %v1395_v1 }
 0x320   : > { %v1246_v45 = vpop.eup %1245 }
 0x321   : > { %1139 = vmatmul.mubr.msk.f32.vlgmr.msra.gmra.mrb[4].mxu1 %vm291_vm2, %v1246_v45  ;;  %v538_v46 = vsel %vm291_vm2, %v1246_v45, 0.0 }
 0x322   : > { %539 = vadd.xlane.f32.xlu1 %v538_v46  ;;  %1148 = vmatprep.mubr.msk.f32.mxu1 %vm1394_vm0, %v1395_v1 }
 0x324   : > { %v1248_v47 = vpop.eup %1247 }
 0x325   : > { %v703_v48 = vsel %vm291_vm2, %v1248_v47, 0.0 }
 0x326   : > { %704 = vadd.xlane.f32.xlu0 %v703_v48  ;;  %374 = vadd.xlane.f32.xlu1 %v373_v49 }
 0x342   : > { %v864_v50 = vpop.xlane.xlu1 %863 }
 0x343   : > { %v865_v51 = vsub.f32 %v858_v30, %v864_v50 }
 0x345   : > { %v866_v52 = vmul.f32 1.442695, %v865_v51 }
 0x346   : > { %v707_v53 = vpop.permute.xlu1 %706 }
 0x347   : > { %1249 = vpow2.f32 %v866_v52  ;;  %1147 = vmatpush3.msra.mxu1 %v707_v53 }
 0x348   : > { %1149 = vmatmul.mubr.msk.f32.vlgmr.msra.gmra.mrb[6].mxu1 %vm291_vm2, %v1248_v47  ;;  %1156 = vmatprep.subr.mxu1 %v1395_v1 }
 0x349   : > { %1157 = vmatpush3.msra.mxu1 %v872_v54  ;;  %1158 = vmatprep.mubr.msk.f32.mxu1 %vm1394_vm0, %v1395_v1 }
 0x351   : > { %v1250_v55 = vpop.eup %1249 }
 0x352   : > { %1159 = vmatmul.mubr.msk.f32.vlgmr.msra.gmra.mrb[8].mxu1 %vm291_vm2, %v1250_v55  ;;  %v868_v56 = vsel %vm291_vm2, %v1250_v55, 0.0 }
 0x353   : > { %869 = vadd.xlane.f32.xlu0 %v868_v56 }
 0x3af   : > { %v540_v57 = vpop.xlane.xlu1 %539 }
 0x3b0   : > { %1251 = vrcp.f32 %v540_v57 }
 0x3b3   : > { %v705_v0 = vpop.xlane.xlu0 %704  ;;  %v375_v10 = vpop.xlane.xlu1 %374 }
 0x3b4   : > { %1253 = vrcp.f32 %v705_v0 }
 0x3ba   : > { %v1252_v60 = vpop.eup %1251 }
 0x3be   : > { %v1254_v1 = vpop.eup %1253 }
 0x3e0   : > { %v870_v2 = vpop.xlane.xlu0 %869 }
 0x3e1   : > { %1255 = vrcp.f32 %v870_v2 }
 0x3e2   : > { %1257 = vrcp.f32 %v375_v10 }
 0x3eb   : > { %v1256_v6 = vpop.eup %1255 }
 0x3ec   : > { %v1258_v11 = vpop.eup %1257 }
 0x3f0   : > { %v448_v58 = vpop.f32.mrb[2].mxu1 }
 0x3f1   : > { %v1130_v59 = vpop.f32.mrb[3].mxu1  ;;  %v453_v14 = vmul.f32 %v1258_v11, %v448_v58 }
 0x3f4   : > { %v613_v61 = vpop.f32.mrb[4].mxu1 }
 0x3f5   : > { %v618_v62 = vmul.f32 %v1252_v60, %v613_v61  ;;  %v1140_v63 = vpop.f32.mrb[5].mxu1 }
 0x3f7   : > { %950 = vrot.lane.b32.xlu0 %v618_v62, %s1407_s23 }
 0x41b   : > { %v778_v3 = vpop.f32.mrb[6].mxu1 }
 0x41c   : > { %v783_v4 = vmul.f32 %v1254_v1, %v778_v3  ;;  %v1150_v5 = vpop.f32.mrb[7].mxu1 }
 0x41e   : > { %954 = vrot.lane.b32.xlu1 %v783_v4, %s1408_s6 }
 0x425   : > { %v943_v7 = vpop.f32.mrb[8].mxu1 }
 0x426   : > { %v948_v8 = vmul.f32 %v1256_v6, %v943_v7  ;;  %v1160_v9 = vpop.f32.mrb[9].mxu1 }
 0x428   : > { %958 = vrot.lane.b32.xlu1 %v948_v8, %s1409_s7 }
 0x469   : > { %v951_v12 = vpop.permute.xlu0 %950 }
 0x46a   : > { %v961_v15 = vsel %vm291_vm2, %v453_v14, %v951_v12 }
 0x490   : > { %v955_v13 = vpop.permute.xlu1 %954 }
 0x491   : > { %v963_v16 = vsel %vm962_vm3, %v961_v15, %v955_v13 }
 0x49a   : > { %v959_v17 = vpop.permute.xlu1 %958 }
 0x49b   : > { %v965_v18 = vsel %vm964_vm4, %v963_v16, %v959_v17 }
 0x49c   : > { %966 = vst.msk [vmem:[%s200_s20] sm:$0xff] %vm213_vm1, %v965_v18 }
 0x49d   : > { %1330 = shalt.err (!%p1327_p7)
}
 0x49e   : > { %s1331_s30 = scalar_lea.hbm %s1638_s5, 128  ;;  %s1335_s28 = scalar_lea.hbm %s1686_s3, 256 }
 0x49f   : > { %p1332_p9 = scmp.ne.s32.totalorder %s1638_s5, %s1331_s30  ;;  %p1336_p0 = scmp.lt.u32.totalorder %s1638_s5, %s1686_s3 }
 0x4a0   : > { %p1337_p11 = scmp.lt.u32.totalorder %s1335_s28, %s1331_s30  ;;  %p1339_p4 = scmp.lt.u32.totalorder %s1331_s30, %s1638_s5 }
 0x4a1   : > { %p1333_p2 = pnand %p1332_p9, %p1522_p12 }
 0x4a2   : > { %p1338_p1 = por %p1337_p11, %p1336_p0 }
 0x4a3   : > { %p1334_p5 = pneg %p1333_p2 }
 0x4a4   : > { %p1340_p6 = por %p1339_p4, %p1338_p1 }
 0x4a6   : > { %p1341_p8 = pnand %p1340_p6, %p1334_p5 }
 0x4a8   : > { %1344 = shalt.err (!%p1341_p8)
}
 0x4a9   : > { %1173 = dma.vmem_to_hbm [thread:$0]  (%p1522_p12), %s1640_s4, 128, %s1638_s5, %s968_s16  }
 0x4aa PF: > { %s993_s6 = sand.u32 1, %s1375_s12   ;;  %p1701_p10 = scmp.ne.s32.totalorder %s1691_s19, 0 }
 0x4ab   : > { %p1702_p13 = scmp.ge.s32.totalorder %s1387_s15, 2  ;;  %s994_s7 = scalar_lea.sflag [#allocation4], %s993_s6 }
 0x4ad   : > { %p1184_p3 = pnand %p1702_p13, %p1701_p10 }
 0x4af   : > { %1370 = dma.done.wait (!%p1184_p3), %s994_s7, 128  }
 0x4b0   : > { %1372 = vsyncadd (!%p1184_p3), %s994_s7, 4294967168  ;;  %p17_p7 = scmp.ge.s32.totalorder %s1487_s24, 4   ;;  %s1703_s12 = smov %s1379_s13 }
 0x4b1   : > { %s1704_s13 = smov %s1383_s14  ;;  %s1705_s14 = smov %s1518_s17 }
 0x4b2   : > { %s1706_s15 = smov %s1487_s24  ;;  %19 = sbr.rel (!%p17_p7) target bundleno = 6 (0x6), region = 81 }
 0x4b9   :  { %999 = vsyncpa [#allocation3], 1 }
 0x4ba   :  { %1001 = vsyncpa [#allocation3 + $0x1], 1 }
 0x4bb   :  { %1002 = vsyncpa [#allocation6], 1 }
 0x4bc   :  { %1003 = vsyncpa [#allocation4], 1 }
 0x4bd   :  { %1005 = vsyncpa [#allocation4 + $0x1], 1 }

</bundles_post_ra>
